<compile_context>
chip_gen: v7x
topology: tpu7x:2x2x1
jax: 0.10.0
libtpu: 0.0.40
codegen_flags: <defaults>
</compile_context>

<pallas_src>
import math
import functools

import jax
import jax.numpy as jnp
from jax import lax
from jax.experimental import pallas as pl
from jax.experimental.pallas import tpu as pltpu


_LN_EPS = 1e-5
_VMEM_LIMIT = 32 * 1024 * 1024  # whole model + activations here are <1 MiB; safe on v5e/v6e/v7x


def _round_up(x, m):
    return ((x + m - 1) // m) * m


def _bf16(x):
    return x.astype(jnp.bfloat16)


def _layernorm(x, g, b, eps=_LN_EPS):
    mean = jnp.mean(x, axis=-1, keepdims=True)
    xc = x - mean
    var = jnp.mean(xc * xc, axis=-1, keepdims=True)  # biased variance (PyTorch LayerNorm)
    return xc * lax.rsqrt(var + eps) * g + b


def _pick_batch_block(batch):
    """Batch samples per grid step: keep >=2 'parallel' steps (v7x megacore) when possible,
    while batching as many rows as possible into each MXU push."""
    if batch < 2:
        return max(batch, 1)
    for steps in (2, 3, 4, 5, 6, 7, 8):
        if batch % steps == 0:
            return batch // steps
    return 1


def _const_spec(arr):
    nd = arr.ndim
    return pl.BlockSpec(tuple(arr.shape), lambda *_: (0,) * nd)


# ----------------------------------------------------------------------------
# The single fused forward kernel
# ----------------------------------------------------------------------------

def _fused_forward_kernel(x_ref, pe_ref,
                          w_in_ref, b_in_ref, g_in_ref, beta_in_ref,
                          wqkv_ref, bqkv_ref, wo_ref, bo_ref,
                          g1_ref, b1_ref, wf1_ref, bf1_ref,
                          wf2_ref, bf2_ref, g2_ref, b2_ref,
                          w_out_ref, b_out_ref, o_ref,
                          *, num_layers, num_heads, scale, batch_block, seq_len):
    bblk, s = batch_block, seq_len
    e = pe_ref.shape[-1]
    hd = e // num_heads
    m = bblk * s

    # --- embed: linear_in + LayerNorm_in + PE add (dropouts are identity in eval) ---
    x = x_ref[...].reshape(m, x_ref.shape[-1])                    # leading-dim reshape (free)
    h = jnp.dot(_bf16(x), w_in_ref[...], preferred_element_type=jnp.float32) + b_in_ref[...]
    h = _layernorm(h, g_in_ref[...], beta_in_ref[...])
    h = (h.reshape(bblk, s, e) + pe_ref[...]).reshape(m, e)       # broadcast PE over batch block

    # --- encoder layers (post-LN), fully VMEM-resident ---
    for li in range(num_layers):
        # fused QKV projection over all rows of the batch block
        qkv = jnp.dot(_bf16(h), wqkv_ref[li], preferred_element_type=jnp.float32)
        qkv = qkv + bqkv_ref[li]                                  # [m, 3E]

        # stack (sample, head) slices -> batched attention (2 dot_generals, 1 softmax)
        q_parts, k_parts, v_parts = [], [], []
        for bi in range(bblk):
            rows = qkv[bi * s:(bi + 1) * s]                       # [S, 3E], static slice
            for hh in range(num_heads):
                lo = hh * hd
                q_parts.append(rows[:, lo:lo + hd] * scale)       # fold scale into q
                k_parts.append(rows[:, e + lo:e + lo + hd])
                v_parts.append(rows[:, 2 * e + lo:2 * e + lo + hd])
        qh = _bf16(jnp.stack(q_parts, axis=0))                    # [bblk*H, S, hd]
        kh = _bf16(jnp.stack(k_parts, axis=0))
        vh = _bf16(jnp.stack(v_parts, axis=0))

        sc = jnp.einsum('nqd,nkd->nqk', qh, kh,
                        preferred_element_type=jnp.float32)        # [bblk*H, S, S]
        mx = jnp.max(sc, axis=-1, keepdims=True)
        p = jnp.exp(sc - mx)
        p = p * pl.reciprocal(jnp.sum(p, axis=-1, keepdims=True), approx=True)
        ctx = jnp.einsum('nqk,nkd->nqd', _bf16(p), vh,
                         preferred_element_type=jnp.float32)       # [bblk*H, S, hd]

        # heads back to lanes (disjoint column offsets), samples back to rows -> [m, E]
        ctx = jnp.concatenate(
            [jnp.concatenate([ctx[bi * num_heads + hh] for hh in range(num_heads)], axis=-1)
             for bi in range(bblk)], axis=0)

        # ONE out_proj GEMM for all rows / heads
        attn = jnp.dot(_bf16(ctx), wo_ref[li], preferred_element_type=jnp.float32) + bo_ref[li]

        # residual + LayerNorm 1
        h = _layernorm(h + attn, g1_ref[li], b1_ref[li])

        # feed-forward (ReLU), intermediate stays in VMEM
        ff = jnp.dot(_bf16(h), wf1_ref[li], preferred_element_type=jnp.float32) + bf1_ref[li]
        ff = jnp.maximum(ff, 0.0)
        ff = jnp.dot(_bf16(ff), wf2_ref[li], preferred_element_type=jnp.float32) + bf2_ref[li]

        # residual + LayerNorm 2
        h = _layernorm(h + ff, g2_ref[li], b2_ref[li])

    # --- linear_out into a 128-lane-dense padded slab (only HBM store of the kernel) ---
    out = jnp.dot(_bf16(h), w_out_ref[...], preferred_element_type=jnp.float32) + b_out_ref[...]
    o_ref[...] = out.reshape(bblk, s, -1).astype(o_ref.dtype)


# ----------------------------------------------------------------------------
# Wrapper
# ----------------------------------------------------------------------------

def mini_transformer_forward(params, x, *, num_heads, num_out):
    """x: [B, S, input_size] (batch_first=True). Returns [B, S, num_out]."""
    B, S, Din = x.shape
    E = params["pe"].shape[1]
    L = params["wqkv"].shape[0]
    n_pad = params["linear_out_w"].shape[-1]
    scale = 1.0 / math.sqrt(E // num_heads)

    bblk = _pick_batch_block(B)
    grid = (B // bblk,)
    pe_s = params["pe"][:S]                                       # [S, E], passed once

    kernel = functools.partial(
        _fused_forward_kernel,
        num_layers=int(L), num_heads=num_heads, scale=scale,
        batch_block=bblk, seq_len=S)

    out = pl.pallas_call(
        kernel,
        out_shape=jax.ShapeDtypeStruct((B, S, n_pad), jnp.float32),
        grid=grid,
        in_specs=[
            pl.BlockSpec((bblk, S, Din), lambda i: (i, 0, 0)),
            _const_spec(pe_s),
            _const_spec(params["linear_in_w"]), _const_spec(params["linear_in_b"]),
            _const_spec(params["ln_in_g"]), _const_spec(params["ln_in_b"]),
            _const_spec(params["wqkv"]), _const_spec(params["bqkv"]),
            _const_spec(params["wo"]), _const_spec(params["bo"]),
            _const_spec(params["ln1_g"]), _const_spec(params["ln1_b"]),
            _const_spec(params["wf1"]), _const_spec(params["bf1"]),
            _const_spec(params["wf2"]), _const_spec(params["bf2"]),
            _const_spec(params["ln2_g"]), _const_spec(params["ln2_b"]),
            _const_spec(params["linear_out_w"]), _const_spec(params["linear_out_b"]),
        ],
        out_specs=pl.BlockSpec((bblk, S, n_pad), lambda i: (i, 0, 0)),
        compiler_params=pltpu.CompilerParams(
            dimension_semantics=("parallel",),
            vmem_limit_bytes=_VMEM_LIMIT,
        ),
    )(x, pe_s,
      params["linear_in_w"], params["linear_in_b"],
      params["ln_in_g"], params["ln_in_b"],
      params["wqkv"], params["bqkv"], params["wo"], params["bo"],
      params["ln1_g"], params["ln1_b"], params["wf1"], params["bf1"],
      params["wf2"], params["bf2"], params["ln2_g"], params["ln2_b"],
      params["linear_out_w"], params["linear_out_b"])

    return out[..., :num_out]


# ----------------------------------------------------------------------------
# Parameters (deterministic synthetic init)
# ----------------------------------------------------------------------------

def _dense_init(key, fan_in, fan_out, scale=0.05):
    kw, kb = jax.random.split(key)
    # matmul weights stored bf16 (MXU operands); biases stay f32
    w = (jax.random.normal(kw, (fan_in, fan_out), jnp.float32) * scale).astype(jnp.bfloat16)
    b = jax.random.normal(kb, (fan_out,), jnp.float32) * scale
    return w, b


def make_positional_encoding(d_model, max_len):
    position = jnp.arange(max_len, dtype=jnp.float32)[:, None]
    div_term = jnp.exp(
        jnp.arange(0, d_model, 2, dtype=jnp.float32) * (-math.log(10000.0) / d_model))
    pe = jnp.zeros((max_len, d_model), jnp.float32)
    pe = pe.at[:, 0::2].set(jnp.sin(position * div_term))
    pe = pe.at[:, 1::2].set(jnp.cos(position * div_term))
    return pe  # [max_len, d_model]


def init_params(key, *, input_size, output_size, num_obstacles, embed_size,
                hidden_size, num_layers, max_sequence_length):
    n_out = output_size * num_obstacles
    n_pad = _round_up(n_out, 128)   # lane-dense output slab; sliced back in the wrapper

    keys = jax.random.split(key, num_layers + 2)
    params = {}

    w, b = _dense_init(keys[0], input_size, embed_size)
    params["linear_in_w"] = w
    params["linear_in_b"] = b.reshape(1, embed_size)
    params["ln_in_g"] = jnp.ones((1, embed_size), jnp.float32)
    params["ln_in_b"] = jnp.zeros((1, embed_size), jnp.float32)
    params["pe"] = make_positional_encoding(embed_size, max_sequence_length)

    wqkv, bqkv, wo, bo = [], [], [], []
    wf1, bf1, wf2, bf2 = [], [], [], []
    g1, b1, g2, b2 = [], [], [], []
    for li in range(num_layers):
        lk = jax.random.split(keys[1 + li], 4)
        w_, b_ = _dense_init(lk[0], embed_size, 3 * embed_size)
        wqkv.append(w_); bqkv.append(b_.reshape(1, -1))
        w_, b_ = _dense_init(lk[1], embed_size, embed_size)
        wo.append(w_); bo.append(b_.reshape(1, -1))
        w_, b_ = _dense_init(lk[2], embed_size, hidden_size)
        wf1.append(w_); bf1.append(b_.reshape(1, -1))
        w_, b_ = _dense_init(lk[3], hidden_size, embed_size)
        wf2.append(w_); bf2.append(b_.reshape(1, -1))
        g1.append(jnp.ones((1, embed_size), jnp.float32))
        b1.append(jnp.zeros((1, embed_size), jnp.float32))
        g2.append(jnp.ones((1, embed_size), jnp.float32))
        b2.append(jnp.zeros((1, embed_size), jnp.float32))

    # stacked per-layer weights (leading layer axis; kernel loops over it in VMEM)
    params["wqkv"] = jnp.stack(wqkv); params["bqkv"] = jnp.stack(bqkv)
    params["wo"] = jnp.stack(wo);     params["bo"] = jnp.stack(bo)
    params["ln1_g"] = jnp.stack(g1);  params["ln1_b"] = jnp.stack(b1)
    params["wf1"] = jnp.stack(wf1);   params["bf1"] = jnp.stack(bf1)
    params["wf2"] = jnp.stack(wf2);   params["bf2"] = jnp.stack(bf2)
    params["ln2_g"] = jnp.stack(g2);  params["ln2_b"] = jnp.stack(b2)

    # linear_out padded to a multiple of 128 lanes (zeros in the pad)
    w, b = _dense_init(keys[num_layers + 1], embed_size, n_out)
    params["linear_out_w"] = jnp.zeros((embed_size, n_pad), jnp.bfloat16).at[:, :n_out].set(w)
    params["linear_out_b"] = jnp.zeros((1, n_pad), jnp.float32).at[0, :n_out].set(b)
    return params


# ----------------------------------------------------------------------------
# Demo
# ----------------------------------------------------------------------------

if __name__ == "__main__":
    # small config consistent with the module (embed_size divisible by num_heads)
    B, S = 2, 8
    INPUT_SIZE = 16
    OUTPUT_SIZE = 8
    NUM_OBSTACLES = 3
    EMBED_SIZE = 32
    HIDDEN_SIZE = 64
    NUM_HEADS = 4
    NUM_LAYERS = 2
    MAX_SEQ_LEN = 16
    NUM_OUT = OUTPUT_SIZE * NUM_OBSTACLES

    key = jax.random.PRNGKey(0)
    kp, kx = jax.random.split(key)

    params = init_params(
        kp,
        input_size=INPUT_SIZE,
        output_size=OUTPUT_SIZE,
        num_obstacles=NUM_OBSTACLES,
        embed_size=EMBED_SIZE,
        hidden_size=HIDDEN_SIZE,
        num_layers=NUM_LAYERS,
        max_sequence_length=MAX_SEQ_LEN,
    )
    x = jax.random.normal(kx, (B, S, INPUT_SIZE), jnp.float32)

    fwd = jax.jit(functools.partial(
        mini_transformer_forward, num_heads=NUM_HEADS, num_out=NUM_OUT))
    out = fwd(params, x)
    jax.block_until_ready(out)

    assert out.shape == (B, S, NUM_OUT), out.shape
    assert bool(jnp.all(jnp.isfinite(out)))

    print("KERNEL_OK")
</pallas_src>

<mosaic_0001>
module attributes {stable_mosaic.version = 11 : i64} {
  func.func @_fused_forward_kernel(%arg0: i32, %arg1: memref<1x8x16xf32, #tpu.memory_space<vmem>>, %arg2: memref<8x32xf32, #tpu.memory_space<vmem>>, %arg3: memref<16x32xbf16, #tpu.memory_space<vmem>>, %arg4: memref<1x32xf32, #tpu.memory_space<vmem>>, %arg5: memref<1x32xf32, #tpu.memory_space<vmem>>, %arg6: memref<1x32xf32, #tpu.memory_space<vmem>>, %arg7: memref<2x32x96xbf16, #tpu.memory_space<vmem>>, %arg8: memref<2x1x96xf32, #tpu.memory_space<vmem>>, %arg9: memref<2x32x32xbf16, #tpu.memory_space<vmem>>, %arg10: memref<2x1x32xf32, #tpu.memory_space<vmem>>, %arg11: memref<2x1x32xf32, #tpu.memory_space<vmem>>, %arg12: memref<2x1x32xf32, #tpu.memory_space<vmem>>, %arg13: memref<2x32x64xbf16, #tpu.memory_space<vmem>>, %arg14: memref<2x1x64xf32, #tpu.memory_space<vmem>>, %arg15: memref<2x64x32xbf16, #tpu.memory_space<vmem>>, %arg16: memref<2x1x32xf32, #tpu.memory_space<vmem>>, %arg17: memref<2x1x32xf32, #tpu.memory_space<vmem>>, %arg18: memref<2x1x32xf32, #tpu.memory_space<vmem>>, %arg19: memref<32x128xbf16, #tpu.memory_space<vmem>>, %arg20: memref<1x128xf32, #tpu.memory_space<vmem>>, %arg21: memref<1x8x128xf32, #tpu.memory_space<vmem>>) attributes {dimension_semantics = [#tpu.dimension_semantics<parallel>], iteration_bounds = array<i64: 2>, scalar_prefetch = 0 : i64, scratch_operands = 0 : i64, tpu.core_type = #tpu.core_type<tc>, window_params = [{transform_indices = @transform_0, window_bounds = array<i64: 1, 8, 16>}, {pipeline_mode = #tpu.pipeline_mode<synchronous>, transform_indices = @transform_1, window_bounds = array<i64: 8, 32>}, {pipeline_mode = #tpu.pipeline_mode<synchronous>, transform_indices = @transform_2, window_bounds = array<i64: 16, 32>}, {pipeline_mode = #tpu.pipeline_mode<synchronous>, transform_indices = @transform_3, window_bounds = array<i64: 1, 32>}, {pipeline_mode = #tpu.pipeline_mode<synchronous>, transform_indices = @transform_4, window_bounds = array<i64: 1, 32>}, {pipeline_mode = #tpu.pipeline_mode<synchronous>, transform_indices = @transform_5, window_bounds = array<i64: 1, 32>}, {pipeline_mode = #tpu.pipeline_mode<synchronous>, transform_indices = @transform_6, window_bounds = array<i64: 2, 32, 96>}, {pipeline_mode = #tpu.pipeline_mode<synchronous>, transform_indices = @transform_7, window_bounds = array<i64: 2, 1, 96>}, {pipeline_mode = #tpu.pipeline_mode<synchronous>, transform_indices = @transform_8, window_bounds = array<i64: 2, 32, 32>}, {pipeline_mode = #tpu.pipeline_mode<synchronous>, transform_indices = @transform_9, window_bounds = array<i64: 2, 1, 32>}, {pipeline_mode = #tpu.pipeline_mode<synchronous>, transform_indices = @transform_10, window_bounds = array<i64: 2, 1, 32>}, {pipeline_mode = #tpu.pipeline_mode<synchronous>, transform_indices = @transform_11, window_bounds = array<i64: 2, 1, 32>}, {pipeline_mode = #tpu.pipeline_mode<synchronous>, transform_indices = @transform_12, window_bounds = array<i64: 2, 32, 64>}, {pipeline_mode = #tpu.pipeline_mode<synchronous>, transform_indices = @transform_13, window_bounds = array<i64: 2, 1, 64>}, {pipeline_mode = #tpu.pipeline_mode<synchronous>, transform_indices = @transform_14, window_bounds = array<i64: 2, 64, 32>}, {pipeline_mode = #tpu.pipeline_mode<synchronous>, transform_indices = @transform_15, window_bounds = array<i64: 2, 1, 32>}, {pipeline_mode = #tpu.pipeline_mode<synchronous>, transform_indices = @transform_16, window_bounds = array<i64: 2, 1, 32>}, {pipeline_mode = #tpu.pipeline_mode<synchronous>, transform_indices = @transform_17, window_bounds = array<i64: 2, 1, 32>}, {pipeline_mode = #tpu.pipeline_mode<synchronous>, transform_indices = @transform_18, window_bounds = array<i64: 32, 128>}, {pipeline_mode = #tpu.pipeline_mode<synchronous>, transform_indices = @transform_19, window_bounds = array<i64: 1, 128>}, {transform_indices = @transform_20, window_bounds = array<i64: 1, 8, 128>}]} {
    %c0 = arith.constant 0 : index
    %c0_0 = arith.constant 0 : index
    %c0_1 = arith.constant 0 : index
    %0 = vector.load %arg1[%c0, %c0_0, %c0_1] : memref<1x8x16xf32, #tpu.memory_space<vmem>>, vector<1x8x16xf32>
    %1 = vector.shape_cast %0 : vector<1x8x16xf32> to vector<8x16xf32>
    %2 = arith.truncf %1 : vector<8x16xf32> to vector<8x16xbf16>
    %c0_2 = arith.constant 0 : index
    %c0_3 = arith.constant 0 : index
    %3 = vector.load %arg3[%c0_2, %c0_3] : memref<16x32xbf16, #tpu.memory_space<vmem>>, vector<16x32xbf16>
    %cst = arith.constant dense<0.000000e+00> : vector<8x32xf32>
    %4 = tpu.matmul %2, %3, %cst {dimension_numbers = #tpu.dot_dimension_numbers<[1], [0], [0], [1], [0, 0, 1, 1], [], []>} : vector<8x16xbf16>, vector<16x32xbf16>, vector<8x32xf32> -> vector<8x32xf32>
    %c0_4 = arith.constant 0 : index
    %c0_5 = arith.constant 0 : index
    %5 = vector.load %arg4[%c0_4, %c0_5] : memref<1x32xf32, #tpu.memory_space<vmem>>, vector<1x32xf32>
    %6 = vector.broadcast %5 : vector<1x32xf32> to vector<8x32xf32>
    %7 = arith.addf %4, %6 : vector<8x32xf32>
    %c0_6 = arith.constant 0 : index
    %c0_7 = arith.constant 0 : index
    %8 = vector.load %arg5[%c0_6, %c0_7] : memref<1x32xf32, #tpu.memory_space<vmem>>, vector<1x32xf32>
    %c0_8 = arith.constant 0 : index
    %c0_9 = arith.constant 0 : index
    %9 = vector.load %arg6[%c0_8, %c0_9] : memref<1x32xf32, #tpu.memory_space<vmem>>, vector<1x32xf32>
    %cst_10 = arith.constant dense<0.000000e+00> : vector<8xf32>
    %10 = vector.multi_reduction <add>, %7, %cst_10 [1] : vector<8x32xf32> to vector<8xf32>
    %11 = vector.shape_cast %10 : vector<8xf32> to vector<8x1xf32>
    %cst_11 = arith.constant 3.200000e+01 : f32
    %12 = vector.broadcast %cst_11 : f32 to vector<8x1xf32>
    %13 = arith.divf %11, %12 : vector<8x1xf32>
    %14 = vector.broadcast %13 : vector<8x1xf32> to vector<8x32xf32>
    %15 = arith.subf %7, %14 : vector<8x32xf32>
    %16 = arith.mulf %15, %15 : vector<8x32xf32>
    %cst_12 = arith.constant dense<0.000000e+00> : vector<8xf32>
    %17 = vector.multi_reduction <add>, %16, %cst_12 [1] : vector<8x32xf32> to vector<8xf32>
    %18 = vector.shape_cast %17 : vector<8xf32> to vector<8x1xf32>
    %cst_13 = arith.constant 3.200000e+01 : f32
    %19 = vector.broadcast %cst_13 : f32 to vector<8x1xf32>
    %20 = arith.divf %18, %19 : vector<8x1xf32>
    %cst_14 = arith.constant 9.99999974E-6 : f32
    %21 = vector.broadcast %cst_14 : f32 to vector<8x1xf32>
    %22 = arith.addf %20, %21 : vector<8x1xf32>
    %23 = math.rsqrt %22 : vector<8x1xf32>
    %24 = vector.broadcast %23 : vector<8x1xf32> to vector<8x32xf32>
    %25 = arith.mulf %15, %24 : vector<8x32xf32>
    %26 = vector.broadcast %8 : vector<1x32xf32> to vector<8x32xf32>
    %27 = arith.mulf %25, %26 : vector<8x32xf32>
    %28 = vector.broadcast %9 : vector<1x32xf32> to vector<8x32xf32>
    %29 = arith.addf %27, %28 : vector<8x32xf32>
    %30 = vector.shape_cast %29 : vector<8x32xf32> to vector<1x8x32xf32>
    %c0_15 = arith.constant 0 : index
    %c0_16 = arith.constant 0 : index
    %31 = vector.load %arg2[%c0_15, %c0_16] : memref<8x32xf32, #tpu.memory_space<vmem>>, vector<8x32xf32>
    %32 = vector.shape_cast %31 : vector<8x32xf32> to vector<1x8x32xf32>
    %33 = arith.addf %30, %32 : vector<1x8x32xf32>
    %34 = vector.shape_cast %33 : vector<1x8x32xf32> to vector<8x32xf32>
    %35 = arith.truncf %34 : vector<8x32xf32> to vector<8x32xbf16>
    %c0_17 = arith.constant 0 : index
    %c0_18 = arith.constant 0 : index
    %c0_19 = arith.constant 0 : index
    %36 = vector.load %arg7[%c0_17, %c0_18, %c0_19] : memref<2x32x96xbf16, #tpu.memory_space<vmem>>, vector<1x32x96xbf16>
    %37 = vector.shape_cast %36 : vector<1x32x96xbf16> to vector<32x96xbf16>
    %cst_20 = arith.constant dense<0.000000e+00> : vector<8x96xf32>
    %38 = tpu.matmul %35, %37, %cst_20 {dimension_numbers = #tpu.dot_dimension_numbers<[1], [0], [0], [1], [0, 0, 1, 1], [], []>} : vector<8x32xbf16>, vector<32x96xbf16>, vector<8x96xf32> -> vector<8x96xf32>
    %c0_21 = arith.constant 0 : index
    %c0_22 = arith.constant 0 : index
    %c0_23 = arith.constant 0 : index
    %39 = vector.load %arg8[%c0_21, %c0_22, %c0_23] : memref<2x1x96xf32, #tpu.memory_space<vmem>>, vector<1x1x96xf32>
    %40 = vector.shape_cast %39 : vector<1x1x96xf32> to vector<1x96xf32>
    %41 = vector.broadcast %40 : vector<1x96xf32> to vector<8x96xf32>
    %42 = arith.addf %38, %41 : vector<8x96xf32>
    %43 = vector.extract_strided_slice %42 {offsets = [0, 0], sizes = [8, 8], strides = [1, 1]} : vector<8x96xf32> to vector<8x8xf32>
    %cst_24 = arith.constant 0.353553385 : f32
    %44 = vector.broadcast %cst_24 : f32 to vector<8x8xf32>
    %45 = arith.mulf %43, %44 : vector<8x8xf32>
    %46 = vector.extract_strided_slice %42 {offsets = [0, 32], sizes = [8, 8], strides = [1, 1]} : vector<8x96xf32> to vector<8x8xf32>
    %47 = vector.extract_strided_slice %42 {offsets = [0, 64], sizes = [8, 8], strides = [1, 1]} : vector<8x96xf32> to vector<8x8xf32>
    %48 = vector.extract_strided_slice %42 {offsets = [0, 8], sizes = [8, 8], strides = [1, 1]} : vector<8x96xf32> to vector<8x8xf32>
    %cst_25 = arith.constant 0.353553385 : f32
    %49 = vector.broadcast %cst_25 : f32 to vector<8x8xf32>
    %50 = arith.mulf %48, %49 : vector<8x8xf32>
    %51 = vector.extract_strided_slice %42 {offsets = [0, 40], sizes = [8, 8], strides = [1, 1]} : vector<8x96xf32> to vector<8x8xf32>
    %52 = vector.extract_strided_slice %42 {offsets = [0, 72], sizes = [8, 8], strides = [1, 1]} : vector<8x96xf32> to vector<8x8xf32>
    %53 = vector.extract_strided_slice %42 {offsets = [0, 16], sizes = [8, 8], strides = [1, 1]} : vector<8x96xf32> to vector<8x8xf32>
    %cst_26 = arith.constant 0.353553385 : f32
    %54 = vector.broadcast %cst_26 : f32 to vector<8x8xf32>
    %55 = arith.mulf %53, %54 : vector<8x8xf32>
    %56 = vector.extract_strided_slice %42 {offsets = [0, 48], sizes = [8, 8], strides = [1, 1]} : vector<8x96xf32> to vector<8x8xf32>
    %57 = vector.extract_strided_slice %42 {offsets = [0, 80], sizes = [8, 8], strides = [1, 1]} : vector<8x96xf32> to vector<8x8xf32>
    %58 = vector.extract_strided_slice %42 {offsets = [0, 24], sizes = [8, 8], strides = [1, 1]} : vector<8x96xf32> to vector<8x8xf32>
    %cst_27 = arith.constant 0.353553385 : f32
    %59 = vector.broadcast %cst_27 : f32 to vector<8x8xf32>
    %60 = arith.mulf %58, %59 : vector<8x8xf32>
    %61 = vector.extract_strided_slice %42 {offsets = [0, 56], sizes = [8, 8], strides = [1, 1]} : vector<8x96xf32> to vector<8x8xf32>
    %62 = vector.extract_strided_slice %42 {offsets = [0, 88], sizes = [8, 8], strides = [1, 1]} : vector<8x96xf32> to vector<8x8xf32>
    %63 = vector.shape_cast %45 : vector<8x8xf32> to vector<1x8x8xf32>
    %64 = vector.shape_cast %50 : vector<8x8xf32> to vector<1x8x8xf32>
    %65 = vector.shape_cast %55 : vector<8x8xf32> to vector<1x8x8xf32>
    %66 = vector.shape_cast %60 : vector<8x8xf32> to vector<1x8x8xf32>
    %67 = tpu.concatenate %63, %64, %65, %66 in 0 : vector<1x8x8xf32>, vector<1x8x8xf32>, vector<1x8x8xf32>, vector<1x8x8xf32> -> vector<4x8x8xf32>
    %68 = arith.truncf %67 : vector<4x8x8xf32> to vector<4x8x8xbf16>
    %69 = vector.shape_cast %46 : vector<8x8xf32> to vector<1x8x8xf32>
    %70 = vector.shape_cast %51 : vector<8x8xf32> to vector<1x8x8xf32>
    %71 = vector.shape_cast %56 : vector<8x8xf32> to vector<1x8x8xf32>
    %72 = vector.shape_cast %61 : vector<8x8xf32> to vector<1x8x8xf32>
    %73 = tpu.concatenate %69, %70, %71, %72 in 0 : vector<1x8x8xf32>, vector<1x8x8xf32>, vector<1x8x8xf32>, vector<1x8x8xf32> -> vector<4x8x8xf32>
    %74 = arith.truncf %73 : vector<4x8x8xf32> to vector<4x8x8xbf16>
    %75 = vector.shape_cast %47 : vector<8x8xf32> to vector<1x8x8xf32>
    %76 = vector.shape_cast %52 : vector<8x8xf32> to vector<1x8x8xf32>
    %77 = vector.shape_cast %57 : vector<8x8xf32> to vector<1x8x8xf32>
    %78 = vector.shape_cast %62 : vector<8x8xf32> to vector<1x8x8xf32>
    %79 = tpu.concatenate %75, %76, %77, %78 in 0 : vector<1x8x8xf32>, vector<1x8x8xf32>, vector<1x8x8xf32>, vector<1x8x8xf32> -> vector<4x8x8xf32>
    %80 = arith.truncf %79 : vector<4x8x8xf32> to vector<4x8x8xbf16>
    "tpu.trace_start"() <{level = 10 : i32, message = "nqd,nkd->nqk"}> : () -> ()
    %cst_28 = arith.constant dense<0.000000e+00> : vector<4x8x8xf32>
    %81 = tpu.matmul %68, %74, %cst_28 {dimension_numbers = #tpu.dot_dimension_numbers<[2], [2], [1], [1], [0, 0, 0, 1, 1, 1], [0], [0]>} : vector<4x8x8xbf16>, vector<4x8x8xbf16>, vector<4x8x8xf32> -> vector<4x8x8xf32>
    "tpu.trace_stop"() : () -> ()
    %cst_29 = arith.constant dense<0xFF800000> : vector<4x8xf32>
    %82 = vector.multi_reduction <maximumf>, %81, %cst_29 [2] : vector<4x8x8xf32> to vector<4x8xf32>
    %83 = vector.shape_cast %82 : vector<4x8xf32> to vector<4x8x1xf32>
    %84 = vector.broadcast %83 : vector<4x8x1xf32> to vector<4x8x8xf32>
    %85 = arith.subf %81, %84 : vector<4x8x8xf32>
    %86 = math.exp %85 : vector<4x8x8xf32>
    %cst_30 = arith.constant dense<0.000000e+00> : vector<4x8xf32>
    %87 = vector.multi_reduction <add>, %86, %cst_30 [2] : vector<4x8x8xf32> to vector<4x8xf32>
    %88 = vector.shape_cast %87 : vector<4x8xf32> to vector<4x8x1xf32>
    %89 = tpu.reciprocal %88 {approx = true} : vector<4x8x1xf32> -> vector<4x8x1xf32>
    %90 = vector.broadcast %89 : vector<4x8x1xf32> to vector<4x8x8xf32>
    %91 = arith.mulf %86, %90 : vector<4x8x8xf32>
    %92 = arith.truncf %91 : vector<4x8x8xf32> to vector<4x8x8xbf16>
    "tpu.trace_start"() <{level = 10 : i32, message = "nqk,nkd->nqd"}> : () -> ()
    %cst_31 = arith.constant dense<0.000000e+00> : vector<4x8x8xf32>
    %93 = tpu.matmul %92, %80, %cst_31 {dimension_numbers = #tpu.dot_dimension_numbers<[2], [1], [1], [2], [0, 0, 0, 1, 1, 2], [0], [0]>} : vector<4x8x8xbf16>, vector<4x8x8xbf16>, vector<4x8x8xf32> -> vector<4x8x8xf32>
    "tpu.trace_stop"() : () -> ()
    %94 = vector.extract_strided_slice %93 {offsets = [0, 0, 0], sizes = [1, 8, 8], strides = [1, 1, 1]} : vector<4x8x8xf32> to vector<1x8x8xf32>
    %95 = vector.shape_cast %94 : vector<1x8x8xf32> to vector<8x8xf32>
    %96 = vector.extract_strided_slice %93 {offsets = [1, 0, 0], sizes = [1, 8, 8], strides = [1, 1, 1]} : vector<4x8x8xf32> to vector<1x8x8xf32>
    %97 = vector.shape_cast %96 : vector<1x8x8xf32> to vector<8x8xf32>
    %98 = vector.extract_strided_slice %93 {offsets = [2, 0, 0], sizes = [1, 8, 8], strides = [1, 1, 1]} : vector<4x8x8xf32> to vector<1x8x8xf32>
    %99 = vector.shape_cast %98 : vector<1x8x8xf32> to vector<8x8xf32>
    %100 = vector.extract_strided_slice %93 {offsets = [3, 0, 0], sizes = [1, 8, 8], strides = [1, 1, 1]} : vector<4x8x8xf32> to vector<1x8x8xf32>
    %101 = vector.shape_cast %100 : vector<1x8x8xf32> to vector<8x8xf32>
    %102 = tpu.concatenate %95, %97, %99, %101 in 1 : vector<8x8xf32>, vector<8x8xf32>, vector<8x8xf32>, vector<8x8xf32> -> vector<8x32xf32>
    %103 = arith.truncf %102 : vector<8x32xf32> to vector<8x32xbf16>
    %c0_32 = arith.constant 0 : index
    %c0_33 = arith.constant 0 : index
    %c0_34 = arith.constant 0 : index
    %104 = vector.load %arg9[%c0_32, %c0_33, %c0_34] : memref<2x32x32xbf16, #tpu.memory_space<vmem>>, vector<1x32x32xbf16>
    %105 = vector.shape_cast %104 : vector<1x32x32xbf16> to vector<32x32xbf16>
    %cst_35 = arith.constant dense<0.000000e+00> : vector<8x32xf32>
    %106 = tpu.matmul %103, %105, %cst_35 {dimension_numbers = #tpu.dot_dimension_numbers<[1], [0], [0], [1], [0, 0, 1, 1], [], []>} : vector<8x32xbf16>, vector<32x32xbf16>, vector<8x32xf32> -> vector<8x32xf32>
    %c0_36 = arith.constant 0 : index
    %c0_37 = arith.constant 0 : index
    %c0_38 = arith.constant 0 : index
    %107 = vector.load %arg10[%c0_36, %c0_37, %c0_38] : memref<2x1x32xf32, #tpu.memory_space<vmem>>, vector<1x1x32xf32>
    %108 = vector.shape_cast %107 : vector<1x1x32xf32> to vector<1x32xf32>
    %109 = vector.broadcast %108 : vector<1x32xf32> to vector<8x32xf32>
    %110 = arith.addf %106, %109 : vector<8x32xf32>
    %111 = arith.addf %34, %110 : vector<8x32xf32>
    %c0_39 = arith.constant 0 : index
    %c0_40 = arith.constant 0 : index
    %c0_41 = arith.constant 0 : index
    %112 = vector.load %arg11[%c0_39, %c0_40, %c0_41] : memref<2x1x32xf32, #tpu.memory_space<vmem>>, vector<1x1x32xf32>
    %113 = vector.shape_cast %112 : vector<1x1x32xf32> to vector<1x32xf32>
    %c0_42 = arith.constant 0 : index
    %c0_43 = arith.constant 0 : index
    %c0_44 = arith.constant 0 : index
    %114 = vector.load %arg12[%c0_42, %c0_43, %c0_44] : memref<2x1x32xf32, #tpu.memory_space<vmem>>, vector<1x1x32xf32>
    %115 = vector.shape_cast %114 : vector<1x1x32xf32> to vector<1x32xf32>
    %cst_45 = arith.constant dense<0.000000e+00> : vector<8xf32>
    %116 = vector.multi_reduction <add>, %111, %cst_45 [1] : vector<8x32xf32> to vector<8xf32>
    %117 = vector.shape_cast %116 : vector<8xf32> to vector<8x1xf32>
    %cst_46 = arith.constant 3.200000e+01 : f32
    %118 = vector.broadcast %cst_46 : f32 to vector<8x1xf32>
    %119 = arith.divf %117, %118 : vector<8x1xf32>
    %120 = vector.broadcast %119 : vector<8x1xf32> to vector<8x32xf32>
    %121 = arith.subf %111, %120 : vector<8x32xf32>
    %122 = arith.mulf %121, %121 : vector<8x32xf32>
    %cst_47 = arith.constant dense<0.000000e+00> : vector<8xf32>
    %123 = vector.multi_reduction <add>, %122, %cst_47 [1] : vector<8x32xf32> to vector<8xf32>
    %124 = vector.shape_cast %123 : vector<8xf32> to vector<8x1xf32>
    %cst_48 = arith.constant 3.200000e+01 : f32
    %125 = vector.broadcast %cst_48 : f32 to vector<8x1xf32>
    %126 = arith.divf %124, %125 : vector<8x1xf32>
    %cst_49 = arith.constant 9.99999974E-6 : f32
    %127 = vector.broadcast %cst_49 : f32 to vector<8x1xf32>
    %128 = arith.addf %126, %127 : vector<8x1xf32>
    %129 = math.rsqrt %128 : vector<8x1xf32>
    %130 = vector.broadcast %129 : vector<8x1xf32> to vector<8x32xf32>
    %131 = arith.mulf %121, %130 : vector<8x32xf32>
    %132 = vector.broadcast %113 : vector<1x32xf32> to vector<8x32xf32>
    %133 = arith.mulf %131, %132 : vector<8x32xf32>
    %134 = vector.broadcast %115 : vector<1x32xf32> to vector<8x32xf32>
    %135 = arith.addf %133, %134 : vector<8x32xf32>
    %136 = arith.truncf %135 : vector<8x32xf32> to vector<8x32xbf16>
    %c0_50 = arith.constant 0 : index
    %c0_51 = arith.constant 0 : index
    %c0_52 = arith.constant 0 : index
    %137 = vector.load %arg13[%c0_50, %c0_51, %c0_52] : memref<2x32x64xbf16, #tpu.memory_space<vmem>>, vector<1x32x64xbf16>
    %138 = vector.shape_cast %137 : vector<1x32x64xbf16> to vector<32x64xbf16>
    %cst_53 = arith.constant dense<0.000000e+00> : vector<8x64xf32>
    %139 = tpu.matmul %136, %138, %cst_53 {dimension_numbers = #tpu.dot_dimension_numbers<[1], [0], [0], [1], [0, 0, 1, 1], [], []>} : vector<8x32xbf16>, vector<32x64xbf16>, vector<8x64xf32> -> vector<8x64xf32>
    %c0_54 = arith.constant 0 : index
    %c0_55 = arith.constant 0 : index
    %c0_56 = arith.constant 0 : index
    %140 = vector.load %arg14[%c0_54, %c0_55, %c0_56] : memref<2x1x64xf32, #tpu.memory_space<vmem>>, vector<1x1x64xf32>
    %141 = vector.shape_cast %140 : vector<1x1x64xf32> to vector<1x64xf32>
    %142 = vector.broadcast %141 : vector<1x64xf32> to vector<8x64xf32>
    %143 = arith.addf %139, %142 : vector<8x64xf32>
    %cst_57 = arith.constant 0.000000e+00 : f32
    %144 = vector.broadcast %cst_57 : f32 to vector<8x64xf32>
    %145 = arith.maximumf %143, %144 : vector<8x64xf32>
    %146 = arith.truncf %145 : vector<8x64xf32> to vector<8x64xbf16>
    %c0_58 = arith.constant 0 : index
    %c0_59 = arith.constant 0 : index
    %c0_60 = arith.constant 0 : index
    %147 = vector.load %arg15[%c0_58, %c0_59, %c0_60] : memref<2x64x32xbf16, #tpu.memory_space<vmem>>, vector<1x64x32xbf16>
    %148 = vector.shape_cast %147 : vector<1x64x32xbf16> to vector<64x32xbf16>
    %cst_61 = arith.constant dense<0.000000e+00> : vector<8x32xf32>
    %149 = tpu.matmul %146, %148, %cst_61 {dimension_numbers = #tpu.dot_dimension_numbers<[1], [0], [0], [1], [0, 0, 1, 1], [], []>} : vector<8x64xbf16>, vector<64x32xbf16>, vector<8x32xf32> -> vector<8x32xf32>
    %c0_62 = arith.constant 0 : index
    %c0_63 = arith.constant 0 : index
    %c0_64 = arith.constant 0 : index
    %150 = vector.load %arg16[%c0_62, %c0_63, %c0_64] : memref<2x1x32xf32, #tpu.memory_space<vmem>>, vector<1x1x32xf32>
    %151 = vector.shape_cast %150 : vector<1x1x32xf32> to vector<1x32xf32>
    %152 = vector.broadcast %151 : vector<1x32xf32> to vector<8x32xf32>
    %153 = arith.addf %149, %152 : vector<8x32xf32>
    %154 = arith.addf %135, %153 : vector<8x32xf32>
    %c0_65 = arith.constant 0 : index
    %c0_66 = arith.constant 0 : index
    %c0_67 = arith.constant 0 : index
    %155 = vector.load %arg17[%c0_65, %c0_66, %c0_67] : memref<2x1x32xf32, #tpu.memory_space<vmem>>, vector<1x1x32xf32>
    %156 = vector.shape_cast %155 : vector<1x1x32xf32> to vector<1x32xf32>
    %c0_68 = arith.constant 0 : index
    %c0_69 = arith.constant 0 : index
    %c0_70 = arith.constant 0 : index
    %157 = vector.load %arg18[%c0_68, %c0_69, %c0_70] : memref<2x1x32xf32, #tpu.memory_space<vmem>>, vector<1x1x32xf32>
    %158 = vector.shape_cast %157 : vector<1x1x32xf32> to vector<1x32xf32>
    %cst_71 = arith.constant dense<0.000000e+00> : vector<8xf32>
    %159 = vector.multi_reduction <add>, %154, %cst_71 [1] : vector<8x32xf32> to vector<8xf32>
    %160 = vector.shape_cast %159 : vector<8xf32> to vector<8x1xf32>
    %cst_72 = arith.constant 3.200000e+01 : f32
    %161 = vector.broadcast %cst_72 : f32 to vector<8x1xf32>
    %162 = arith.divf %160, %161 : vector<8x1xf32>
    %163 = vector.broadcast %162 : vector<8x1xf32> to vector<8x32xf32>
    %164 = arith.subf %154, %163 : vector<8x32xf32>
    %165 = arith.mulf %164, %164 : vector<8x32xf32>
    %cst_73 = arith.constant dense<0.000000e+00> : vector<8xf32>
    %166 = vector.multi_reduction <add>, %165, %cst_73 [1] : vector<8x32xf32> to vector<8xf32>
    %167 = vector.shape_cast %166 : vector<8xf32> to vector<8x1xf32>
    %cst_74 = arith.constant 3.200000e+01 : f32
    %168 = vector.broadcast %cst_74 : f32 to vector<8x1xf32>
    %169 = arith.divf %167, %168 : vector<8x1xf32>
    %cst_75 = arith.constant 9.99999974E-6 : f32
    %170 = vector.broadcast %cst_75 : f32 to vector<8x1xf32>
    %171 = arith.addf %169, %170 : vector<8x1xf32>
    %172 = math.rsqrt %171 : vector<8x1xf32>
    %173 = vector.broadcast %172 : vector<8x1xf32> to vector<8x32xf32>
    %174 = arith.mulf %164, %173 : vector<8x32xf32>
    %175 = vector.broadcast %156 : vector<1x32xf32> to vector<8x32xf32>
    %176 = arith.mulf %174, %175 : vector<8x32xf32>
    %177 = vector.broadcast %158 : vector<1x32xf32> to vector<8x32xf32>
    %178 = arith.addf %176, %177 : vector<8x32xf32>
    %179 = arith.truncf %178 : vector<8x32xf32> to vector<8x32xbf16>
    %c1 = arith.constant 1 : index
    %c0_76 = arith.constant 0 : index
    %c0_77 = arith.constant 0 : index
    %180 = vector.load %arg7[%c1, %c0_76, %c0_77] : memref<2x32x96xbf16, #tpu.memory_space<vmem>>, vector<1x32x96xbf16>
    %181 = vector.shape_cast %180 : vector<1x32x96xbf16> to vector<32x96xbf16>
    %cst_78 = arith.constant dense<0.000000e+00> : vector<8x96xf32>
    %182 = tpu.matmul %179, %181, %cst_78 {dimension_numbers = #tpu.dot_dimension_numbers<[1], [0], [0], [1], [0, 0, 1, 1], [], []>} : vector<8x32xbf16>, vector<32x96xbf16>, vector<8x96xf32> -> vector<8x96xf32>
    %c1_79 = arith.constant 1 : index
    %c0_80 = arith.constant 0 : index
    %c0_81 = arith.constant 0 : index
    %183 = vector.load %arg8[%c1_79, %c0_80, %c0_81] : memref<2x1x96xf32, #tpu.memory_space<vmem>>, vector<1x1x96xf32>
    %184 = vector.shape_cast %183 : vector<1x1x96xf32> to vector<1x96xf32>
    %185 = vector.broadcast %184 : vector<1x96xf32> to vector<8x96xf32>
    %186 = arith.addf %182, %185 : vector<8x96xf32>
    %187 = vector.extract_strided_slice %186 {offsets = [0, 0], sizes = [8, 8], strides = [1, 1]} : vector<8x96xf32> to vector<8x8xf32>
    %cst_82 = arith.constant 0.353553385 : f32
    %188 = vector.broadcast %cst_82 : f32 to vector<8x8xf32>
    %189 = arith.mulf %187, %188 : vector<8x8xf32>
    %190 = vector.extract_strided_slice %186 {offsets = [0, 32], sizes = [8, 8], strides = [1, 1]} : vector<8x96xf32> to vector<8x8xf32>
    %191 = vector.extract_strided_slice %186 {offsets = [0, 64], sizes = [8, 8], strides = [1, 1]} : vector<8x96xf32> to vector<8x8xf32>
    %192 = vector.extract_strided_slice %186 {offsets = [0, 8], sizes = [8, 8], strides = [1, 1]} : vector<8x96xf32> to vector<8x8xf32>
    %cst_83 = arith.constant 0.353553385 : f32
    %193 = vector.broadcast %cst_83 : f32 to vector<8x8xf32>
    %194 = arith.mulf %192, %193 : vector<8x8xf32>
    %195 = vector.extract_strided_slice %186 {offsets = [0, 40], sizes = [8, 8], strides = [1, 1]} : vector<8x96xf32> to vector<8x8xf32>
    %196 = vector.extract_strided_slice %186 {offsets = [0, 72], sizes = [8, 8], strides = [1, 1]} : vector<8x96xf32> to vector<8x8xf32>
    %197 = vector.extract_strided_slice %186 {offsets = [0, 16], sizes = [8, 8], strides = [1, 1]} : vector<8x96xf32> to vector<8x8xf32>
    %cst_84 = arith.constant 0.353553385 : f32
    %198 = vector.broadcast %cst_84 : f32 to vector<8x8xf32>
    %199 = arith.mulf %197, %198 : vector<8x8xf32>
    %200 = vector.extract_strided_slice %186 {offsets = [0, 48], sizes = [8, 8], strides = [1, 1]} : vector<8x96xf32> to vector<8x8xf32>
    %201 = vector.extract_strided_slice %186 {offsets = [0, 80], sizes = [8, 8], strides = [1, 1]} : vector<8x96xf32> to vector<8x8xf32>
    %202 = vector.extract_strided_slice %186 {offsets = [0, 24], sizes = [8, 8], strides = [1, 1]} : vector<8x96xf32> to vector<8x8xf32>
    %cst_85 = arith.constant 0.353553385 : f32
    %203 = vector.broadcast %cst_85 : f32 to vector<8x8xf32>
    %204 = arith.mulf %202, %203 : vector<8x8xf32>
    %205 = vector.extract_strided_slice %186 {offsets = [0, 56], sizes = [8, 8], strides = [1, 1]} : vector<8x96xf32> to vector<8x8xf32>
    %206 = vector.extract_strided_slice %186 {offsets = [0, 88], sizes = [8, 8], strides = [1, 1]} : vector<8x96xf32> to vector<8x8xf32>
    %207 = vector.shape_cast %189 : vector<8x8xf32> to vector<1x8x8xf32>
    %208 = vector.shape_cast %194 : vector<8x8xf32> to vector<1x8x8xf32>
    %209 = vector.shape_cast %199 : vector<8x8xf32> to vector<1x8x8xf32>
    %210 = vector.shape_cast %204 : vector<8x8xf32> to vector<1x8x8xf32>
    %211 = tpu.concatenate %207, %208, %209, %210 in 0 : vector<1x8x8xf32>, vector<1x8x8xf32>, vector<1x8x8xf32>, vector<1x8x8xf32> -> vector<4x8x8xf32>
    %212 = arith.truncf %211 : vector<4x8x8xf32> to vector<4x8x8xbf16>
    %213 = vector.shape_cast %190 : vector<8x8xf32> to vector<1x8x8xf32>
    %214 = vector.shape_cast %195 : vector<8x8xf32> to vector<1x8x8xf32>
    %215 = vector.shape_cast %200 : vector<8x8xf32> to vector<1x8x8xf32>
    %216 = vector.shape_cast %205 : vector<8x8xf32> to vector<1x8x8xf32>
    %217 = tpu.concatenate %213, %214, %215, %216 in 0 : vector<1x8x8xf32>, vector<1x8x8xf32>, vector<1x8x8xf32>, vector<1x8x8xf32> -> vector<4x8x8xf32>
    %218 = arith.truncf %217 : vector<4x8x8xf32> to vector<4x8x8xbf16>
    %219 = vector.shape_cast %191 : vector<8x8xf32> to vector<1x8x8xf32>
    %220 = vector.shape_cast %196 : vector<8x8xf32> to vector<1x8x8xf32>
    %221 = vector.shape_cast %201 : vector<8x8xf32> to vector<1x8x8xf32>
    %222 = vector.shape_cast %206 : vector<8x8xf32> to vector<1x8x8xf32>
    %223 = tpu.concatenate %219, %220, %221, %222 in 0 : vector<1x8x8xf32>, vector<1x8x8xf32>, vector<1x8x8xf32>, vector<1x8x8xf32> -> vector<4x8x8xf32>
    %224 = arith.truncf %223 : vector<4x8x8xf32> to vector<4x8x8xbf16>
    "tpu.trace_start"() <{level = 10 : i32, message = "nqd,nkd->nqk"}> : () -> ()
    %cst_86 = arith.constant dense<0.000000e+00> : vector<4x8x8xf32>
    %225 = tpu.matmul %212, %218, %cst_86 {dimension_numbers = #tpu.dot_dimension_numbers<[2], [2], [1], [1], [0, 0, 0, 1, 1, 1], [0], [0]>} : vector<4x8x8xbf16>, vector<4x8x8xbf16>, vector<4x8x8xf32> -> vector<4x8x8xf32>
    "tpu.trace_stop"() : () -> ()
    %cst_87 = arith.constant dense<0xFF800000> : vector<4x8xf32>
    %226 = vector.multi_reduction <maximumf>, %225, %cst_87 [2] : vector<4x8x8xf32> to vector<4x8xf32>
    %227 = vector.shape_cast %226 : vector<4x8xf32> to vector<4x8x1xf32>
    %228 = vector.broadcast %227 : vector<4x8x1xf32> to vector<4x8x8xf32>
    %229 = arith.subf %225, %228 : vector<4x8x8xf32>
    %230 = math.exp %229 : vector<4x8x8xf32>
    %cst_88 = arith.constant dense<0.000000e+00> : vector<4x8xf32>
    %231 = vector.multi_reduction <add>, %230, %cst_88 [2] : vector<4x8x8xf32> to vector<4x8xf32>
    %232 = vector.shape_cast %231 : vector<4x8xf32> to vector<4x8x1xf32>
    %233 = tpu.reciprocal %232 {approx = true} : vector<4x8x1xf32> -> vector<4x8x1xf32>
    %234 = vector.broadcast %233 : vector<4x8x1xf32> to vector<4x8x8xf32>
    %235 = arith.mulf %230, %234 : vector<4x8x8xf32>
    %236 = arith.truncf %235 : vector<4x8x8xf32> to vector<4x8x8xbf16>
    "tpu.trace_start"() <{level = 10 : i32, message = "nqk,nkd->nqd"}> : () -> ()
    %cst_89 = arith.constant dense<0.000000e+00> : vector<4x8x8xf32>
    %237 = tpu.matmul %236, %224, %cst_89 {dimension_numbers = #tpu.dot_dimension_numbers<[2], [1], [1], [2], [0, 0, 0, 1, 1, 2], [0], [0]>} : vector<4x8x8xbf16>, vector<4x8x8xbf16>, vector<4x8x8xf32> -> vector<4x8x8xf32>
    "tpu.trace_stop"() : () -> ()
    %238 = vector.extract_strided_slice %237 {offsets = [0, 0, 0], sizes = [1, 8, 8], strides = [1, 1, 1]} : vector<4x8x8xf32> to vector<1x8x8xf32>
    %239 = vector.shape_cast %238 : vector<1x8x8xf32> to vector<8x8xf32>
    %240 = vector.extract_strided_slice %237 {offsets = [1, 0, 0], sizes = [1, 8, 8], strides = [1, 1, 1]} : vector<4x8x8xf32> to vector<1x8x8xf32>
    %241 = vector.shape_cast %240 : vector<1x8x8xf32> to vector<8x8xf32>
    %242 = vector.extract_strided_slice %237 {offsets = [2, 0, 0], sizes = [1, 8, 8], strides = [1, 1, 1]} : vector<4x8x8xf32> to vector<1x8x8xf32>
    %243 = vector.shape_cast %242 : vector<1x8x8xf32> to vector<8x8xf32>
    %244 = vector.extract_strided_slice %237 {offsets = [3, 0, 0], sizes = [1, 8, 8], strides = [1, 1, 1]} : vector<4x8x8xf32> to vector<1x8x8xf32>
    %245 = vector.shape_cast %244 : vector<1x8x8xf32> to vector<8x8xf32>
    %246 = tpu.concatenate %239, %241, %243, %245 in 1 : vector<8x8xf32>, vector<8x8xf32>, vector<8x8xf32>, vector<8x8xf32> -> vector<8x32xf32>
    %247 = arith.truncf %246 : vector<8x32xf32> to vector<8x32xbf16>
    %c1_90 = arith.constant 1 : index
    %c0_91 = arith.constant 0 : index
    %c0_92 = arith.constant 0 : index
    %248 = vector.load %arg9[%c1_90, %c0_91, %c0_92] : memref<2x32x32xbf16, #tpu.memory_space<vmem>>, vector<1x32x32xbf16>
    %249 = vector.shape_cast %248 : vector<1x32x32xbf16> to vector<32x32xbf16>
    %cst_93 = arith.constant dense<0.000000e+00> : vector<8x32xf32>
    %250 = tpu.matmul %247, %249, %cst_93 {dimension_numbers = #tpu.dot_dimension_numbers<[1], [0], [0], [1], [0, 0, 1, 1], [], []>} : vector<8x32xbf16>, vector<32x32xbf16>, vector<8x32xf32> -> vector<8x32xf32>
    %c1_94 = arith.constant 1 : index
    %c0_95 = arith.constant 0 : index
    %c0_96 = arith.constant 0 : index
    %251 = vector.load %arg10[%c1_94, %c0_95, %c0_96] : memref<2x1x32xf32, #tpu.memory_space<vmem>>, vector<1x1x32xf32>
    %252 = vector.shape_cast %251 : vector<1x1x32xf32> to vector<1x32xf32>
    %253 = vector.broadcast %252 : vector<1x32xf32> to vector<8x32xf32>
    %254 = arith.addf %250, %253 : vector<8x32xf32>
    %255 = arith.addf %178, %254 : vector<8x32xf32>
    %c1_97 = arith.constant 1 : index
    %c0_98 = arith.constant 0 : index
    %c0_99 = arith.constant 0 : index
    %256 = vector.load %arg11[%c1_97, %c0_98, %c0_99] : memref<2x1x32xf32, #tpu.memory_space<vmem>>, vector<1x1x32xf32>
    %257 = vector.shape_cast %256 : vector<1x1x32xf32> to vector<1x32xf32>
    %c1_100 = arith.constant 1 : index
    %c0_101 = arith.constant 0 : index
    %c0_102 = arith.constant 0 : index
    %258 = vector.load %arg12[%c1_100, %c0_101, %c0_102] : memref<2x1x32xf32, #tpu.memory_space<vmem>>, vector<1x1x32xf32>
    %259 = vector.shape_cast %258 : vector<1x1x32xf32> to vector<1x32xf32>
    %cst_103 = arith.constant dense<0.000000e+00> : vector<8xf32>
    %260 = vector.multi_reduction <add>, %255, %cst_103 [1] : vector<8x32xf32> to vector<8xf32>
    %261 = vector.shape_cast %260 : vector<8xf32> to vector<8x1xf32>
    %cst_104 = arith.constant 3.200000e+01 : f32
    %262 = vector.broadcast %cst_104 : f32 to vector<8x1xf32>
    %263 = arith.divf %261, %262 : vector<8x1xf32>
    %264 = vector.broadcast %263 : vector<8x1xf32> to vector<8x32xf32>
    %265 = arith.subf %255, %264 : vector<8x32xf32>
    %266 = arith.mulf %265, %265 : vector<8x32xf32>
    %cst_105 = arith.constant dense<0.000000e+00> : vector<8xf32>
    %267 = vector.multi_reduction <add>, %266, %cst_105 [1] : vector<8x32xf32> to vector<8xf32>
    %268 = vector.shape_cast %267 : vector<8xf32> to vector<8x1xf32>
    %cst_106 = arith.constant 3.200000e+01 : f32
    %269 = vector.broadcast %cst_106 : f32 to vector<8x1xf32>
    %270 = arith.divf %268, %269 : vector<8x1xf32>
    %cst_107 = arith.constant 9.99999974E-6 : f32
    %271 = vector.broadcast %cst_107 : f32 to vector<8x1xf32>
    %272 = arith.addf %270, %271 : vector<8x1xf32>
    %273 = math.rsqrt %272 : vector<8x1xf32>
    %274 = vector.broadcast %273 : vector<8x1xf32> to vector<8x32xf32>
    %275 = arith.mulf %265, %274 : vector<8x32xf32>
    %276 = vector.broadcast %257 : vector<1x32xf32> to vector<8x32xf32>
    %277 = arith.mulf %275, %276 : vector<8x32xf32>
    %278 = vector.broadcast %259 : vector<1x32xf32> to vector<8x32xf32>
    %279 = arith.addf %277, %278 : vector<8x32xf32>
    %280 = arith.truncf %279 : vector<8x32xf32> to vector<8x32xbf16>
    %c1_108 = arith.constant 1 : index
    %c0_109 = arith.constant 0 : index
    %c0_110 = arith.constant 0 : index
    %281 = vector.load %arg13[%c1_108, %c0_109, %c0_110] : memref<2x32x64xbf16, #tpu.memory_space<vmem>>, vector<1x32x64xbf16>
    %282 = vector.shape_cast %281 : vector<1x32x64xbf16> to vector<32x64xbf16>
    %cst_111 = arith.constant dense<0.000000e+00> : vector<8x64xf32>
    %283 = tpu.matmul %280, %282, %cst_111 {dimension_numbers = #tpu.dot_dimension_numbers<[1], [0], [0], [1], [0, 0, 1, 1], [], []>} : vector<8x32xbf16>, vector<32x64xbf16>, vector<8x64xf32> -> vector<8x64xf32>
    %c1_112 = arith.constant 1 : index
    %c0_113 = arith.constant 0 : index
    %c0_114 = arith.constant 0 : index
    %284 = vector.load %arg14[%c1_112, %c0_113, %c0_114] : memref<2x1x64xf32, #tpu.memory_space<vmem>>, vector<1x1x64xf32>
    %285 = vector.shape_cast %284 : vector<1x1x64xf32> to vector<1x64xf32>
    %286 = vector.broadcast %285 : vector<1x64xf32> to vector<8x64xf32>
    %287 = arith.addf %283, %286 : vector<8x64xf32>
    %cst_115 = arith.constant 0.000000e+00 : f32
    %288 = vector.broadcast %cst_115 : f32 to vector<8x64xf32>
    %289 = arith.maximumf %287, %288 : vector<8x64xf32>
    %290 = arith.truncf %289 : vector<8x64xf32> to vector<8x64xbf16>
    %c1_116 = arith.constant 1 : index
    %c0_117 = arith.constant 0 : index
    %c0_118 = arith.constant 0 : index
    %291 = vector.load %arg15[%c1_116, %c0_117, %c0_118] : memref<2x64x32xbf16, #tpu.memory_space<vmem>>, vector<1x64x32xbf16>
    %292 = vector.shape_cast %291 : vector<1x64x32xbf16> to vector<64x32xbf16>
    %cst_119 = arith.constant dense<0.000000e+00> : vector<8x32xf32>
    %293 = tpu.matmul %290, %292, %cst_119 {dimension_numbers = #tpu.dot_dimension_numbers<[1], [0], [0], [1], [0, 0, 1, 1], [], []>} : vector<8x64xbf16>, vector<64x32xbf16>, vector<8x32xf32> -> vector<8x32xf32>
    %c1_120 = arith.constant 1 : index
    %c0_121 = arith.constant 0 : index
    %c0_122 = arith.constant 0 : index
    %294 = vector.load %arg16[%c1_120, %c0_121, %c0_122] : memref<2x1x32xf32, #tpu.memory_space<vmem>>, vector<1x1x32xf32>
    %295 = vector.shape_cast %294 : vector<1x1x32xf32> to vector<1x32xf32>
    %296 = vector.broadcast %295 : vector<1x32xf32> to vector<8x32xf32>
    %297 = arith.addf %293, %296 : vector<8x32xf32>
    %298 = arith.addf %279, %297 : vector<8x32xf32>
    %c1_123 = arith.constant 1 : index
    %c0_124 = arith.constant 0 : index
    %c0_125 = arith.constant 0 : index
    %299 = vector.load %arg17[%c1_123, %c0_124, %c0_125] : memref<2x1x32xf32, #tpu.memory_space<vmem>>, vector<1x1x32xf32>
    %300 = vector.shape_cast %299 : vector<1x1x32xf32> to vector<1x32xf32>
    %c1_126 = arith.constant 1 : index
    %c0_127 = arith.constant 0 : index
    %c0_128 = arith.constant 0 : index
    %301 = vector.load %arg18[%c1_126, %c0_127, %c0_128] : memref<2x1x32xf32, #tpu.memory_space<vmem>>, vector<1x1x32xf32>
    %302 = vector.shape_cast %301 : vector<1x1x32xf32> to vector<1x32xf32>
    %cst_129 = arith.constant dense<0.000000e+00> : vector<8xf32>
    %303 = vector.multi_reduction <add>, %298, %cst_129 [1] : vector<8x32xf32> to vector<8xf32>
    %304 = vector.shape_cast %303 : vector<8xf32> to vector<8x1xf32>
    %cst_130 = arith.constant 3.200000e+01 : f32
    %305 = vector.broadcast %cst_130 : f32 to vector<8x1xf32>
    %306 = arith.divf %304, %305 : vector<8x1xf32>
    %307 = vector.broadcast %306 : vector<8x1xf32> to vector<8x32xf32>
    %308 = arith.subf %298, %307 : vector<8x32xf32>
    %309 = arith.mulf %308, %308 : vector<8x32xf32>
    %cst_131 = arith.constant dense<0.000000e+00> : vector<8xf32>
    %310 = vector.multi_reduction <add>, %309, %cst_131 [1] : vector<8x32xf32> to vector<8xf32>
    %311 = vector.shape_cast %310 : vector<8xf32> to vector<8x1xf32>
    %cst_132 = arith.constant 3.200000e+01 : f32
    %312 = vector.broadcast %cst_132 : f32 to vector<8x1xf32>
    %313 = arith.divf %311, %312 : vector<8x1xf32>
    %cst_133 = arith.constant 9.99999974E-6 : f32
    %314 = vector.broadcast %cst_133 : f32 to vector<8x1xf32>
    %315 = arith.addf %313, %314 : vector<8x1xf32>
    %316 = math.rsqrt %315 : vector<8x1xf32>
    %317 = vector.broadcast %316 : vector<8x1xf32> to vector<8x32xf32>
    %318 = arith.mulf %308, %317 : vector<8x32xf32>
    %319 = vector.broadcast %300 : vector<1x32xf32> to vector<8x32xf32>
    %320 = arith.mulf %318, %319 : vector<8x32xf32>
    %321 = vector.broadcast %302 : vector<1x32xf32> to vector<8x32xf32>
    %322 = arith.addf %320, %321 : vector<8x32xf32>
    %323 = arith.truncf %322 : vector<8x32xf32> to vector<8x32xbf16>
    %c0_134 = arith.constant 0 : index
    %c0_135 = arith.constant 0 : index
    %324 = vector.load %arg19[%c0_134, %c0_135] : memref<32x128xbf16, #tpu.memory_space<vmem>>, vector<32x128xbf16>
    %cst_136 = arith.constant dense<0.000000e+00> : vector<8x128xf32>
    %325 = tpu.matmul %323, %324, %cst_136 {dimension_numbers = #tpu.dot_dimension_numbers<[1], [0], [0], [1], [0, 0, 1, 1], [], []>} : vector<8x32xbf16>, vector<32x128xbf16>, vector<8x128xf32> -> vector<8x128xf32>
    %c0_137 = arith.constant 0 : index
    %c0_138 = arith.constant 0 : index
    %326 = vector.load %arg20[%c0_137, %c0_138] : memref<1x128xf32, #tpu.memory_space<vmem>>, vector<1x128xf32>
    %327 = vector.broadcast %326 : vector<1x128xf32> to vector<8x128xf32>
    %328 = arith.addf %325, %327 : vector<8x128xf32>
    %329 = vector.shape_cast %328 : vector<8x128xf32> to vector<1x8x128xf32>
    %c0_139 = arith.constant 0 : index
    %c0_140 = arith.constant 0 : index
    %c0_141 = arith.constant 0 : index
    %330 = vector.load %arg21[%c0_139, %c0_140, %c0_141] : memref<1x8x128xf32, #tpu.memory_space<vmem>>, vector<1x8x128xf32>
    tpu.vector_store %arg21[%c0_139, %c0_140, %c0_141], %329 {strides = array<i32>} : memref<1x8x128xf32, #tpu.memory_space<vmem>>, vector<1x8x128xf32>,
    return
  }
  func.func @transform_0(%arg0: i32) -> (i32, i32, i32) {
    %c0_i32 = arith.constant 0 : i32
    %c0_i32_0 = arith.constant 0 : i32
    %c0_i32_1 = arith.constant 0 : i32
    return %arg0, %c0_i32, %c0_i32_0 : i32, i32, i32
  }
  func.func @transform_1(%arg0: i32) -> (i32, i32) {
    %c0_i32 = arith.constant 0 : i32
    %c0_i32_0 = arith.constant 0 : i32
    %c0_i32_1 = arith.constant 0 : i32
    return %c0_i32, %c0_i32_0 : i32, i32
  }
  func.func @transform_2(%arg0: i32) -> (i32, i32) {
    %c0_i32 = arith.constant 0 : i32
    %c0_i32_0 = arith.constant 0 : i32
    %c0_i32_1 = arith.constant 0 : i32
    return %c0_i32, %c0_i32_0 : i32, i32
  }
  func.func @transform_3(%arg0: i32) -> (i32, i32) {
    %c0_i32 = arith.constant 0 : i32
    %c0_i32_0 = arith.constant 0 : i32
    %c0_i32_1 = arith.constant 0 : i32
    return %c0_i32, %c0_i32_0 : i32, i32
  }
  func.func @transform_4(%arg0: i32) -> (i32, i32) {
    %c0_i32 = arith.constant 0 : i32
    %c0_i32_0 = arith.constant 0 : i32
    %c0_i32_1 = arith.constant 0 : i32
    return %c0_i32, %c0_i32_0 : i32, i32
  }
  func.func @transform_5(%arg0: i32) -> (i32, i32) {
    %c0_i32 = arith.constant 0 : i32
    %c0_i32_0 = arith.constant 0 : i32
    %c0_i32_1 = arith.constant 0 : i32
    return %c0_i32, %c0_i32_0 : i32, i32
  }
  func.func @transform_6(%arg0: i32) -> (i32, i32, i32) {
    %c0_i32 = arith.constant 0 : i32
    %c0_i32_0 = arith.constant 0 : i32
    %c0_i32_1 = arith.constant 0 : i32
    %c0_i32_2 = arith.constant 0 : i32
    return %c0_i32, %c0_i32_0, %c0_i32_1 : i32, i32, i32
  }
  func.func @transform_7(%arg0: i32) -> (i32, i32, i32) {
    %c0_i32 = arith.constant 0 : i32
    %c0_i32_0 = arith.constant 0 : i32
    %c0_i32_1 = arith.constant 0 : i32
    %c0_i32_2 = arith.constant 0 : i32
    return %c0_i32, %c0_i32_0, %c0_i32_1 : i32, i32, i32
  }
  func.func @transform_8(%arg0: i32) -> (i32, i32, i32) {
    %c0_i32 = arith.constant 0 : i32
    %c0_i32_0 = arith.constant 0 : i32
    %c0_i32_1 = arith.constant 0 : i32
    %c0_i32_2 = arith.constant 0 : i32
    return %c0_i32, %c0_i32_0, %c0_i32_1 : i32, i32, i32
  }
  func.func @transform_9(%arg0: i32) -> (i32, i32, i32) {
    %c0_i32 = arith.constant 0 : i32
    %c0_i32_0 = arith.constant 0 : i32
    %c0_i32_1 = arith.constant 0 : i32
    %c0_i32_2 = arith.constant 0 : i32
    return %c0_i32, %c0_i32_0, %c0_i32_1 : i32, i32, i32
  }
  func.func @transform_10(%arg0: i32) -> (i32, i32, i32) {
    %c0_i32 = arith.constant 0 : i32
    %c0_i32_0 = arith.constant 0 : i32
    %c0_i32_1 = arith.constant 0 : i32
    %c0_i32_2 = arith.constant 0 : i32
    return %c0_i32, %c0_i32_0, %c0_i32_1 : i32, i32, i32
  }
  func.func @transform_11(%arg0: i32) -> (i32, i32, i32) {
    %c0_i32 = arith.constant 0 : i32
    %c0_i32_0 = arith.constant 0 : i32
    %c0_i32_1 = arith.constant 0 : i32
    %c0_i32_2 = arith.constant 0 : i32
    return %c0_i32, %c0_i32_0, %c0_i32_1 : i32, i32, i32
  }
  func.func @transform_12(%arg0: i32) -> (i32, i32, i32) {
    %c0_i32 = arith.constant 0 : i32
    %c0_i32_0 = arith.constant 0 : i32
    %c0_i32_1 = arith.constant 0 : i32
    %c0_i32_2 = arith.constant 0 : i32
    return %c0_i32, %c0_i32_0, %c0_i32_1 : i32, i32, i32
  }
  func.func @transform_13(%arg0: i32) -> (i32, i32, i32) {
    %c0_i32 = arith.constant 0 : i32
    %c0_i32_0 = arith.constant 0 : i32
    %c0_i32_1 = arith.constant 0 : i32
    %c0_i32_2 = arith.constant 0 : i32
    return %c0_i32, %c0_i32_0, %c0_i32_1 : i32, i32, i32
  }
  func.func @transform_14(%arg0: i32) -> (i32, i32, i32) {
    %c0_i32 = arith.constant 0 : i32
    %c0_i32_0 = arith.constant 0 : i32
    %c0_i32_1 = arith.constant 0 : i32
    %c0_i32_2 = arith.constant 0 : i32
    return %c0_i32, %c0_i32_0, %c0_i32_1 : i32, i32, i32
  }
  func.func @transform_15(%arg0: i32) -> (i32, i32, i32) {
    %c0_i32 = arith.constant 0 : i32
    %c0_i32_0 = arith.constant 0 : i32
    %c0_i32_1 = arith.constant 0 : i32
    %c0_i32_2 = arith.constant 0 : i32
    return %c0_i32, %c0_i32_0, %c0_i32_1 : i32, i32, i32
  }
  func.func @transform_16(%arg0: i32) -> (i32, i32, i32) {
    %c0_i32 = arith.constant 0 : i32
    %c0_i32_0 = arith.constant 0 : i32
    %c0_i32_1 = arith.constant 0 : i32
    %c0_i32_2 = arith.constant 0 : i32
    return %c0_i32, %c0_i32_0, %c0_i32_1 : i32, i32, i32
  }
  func.func @transform_17(%arg0: i32) -> (i32, i32, i32) {
    %c0_i32 = arith.constant 0 : i32
    %c0_i32_0 = arith.constant 0 : i32
    %c0_i32_1 = arith.constant 0 : i32
    %c0_i32_2 = arith.constant 0 : i32
    return %c0_i32, %c0_i32_0, %c0_i32_1 : i32, i32, i32
  }
  func.func @transform_18(%arg0: i32) -> (i32, i32) {
    %c0_i32 = arith.constant 0 : i32
    %c0_i32_0 = arith.constant 0 : i32
    %c0_i32_1 = arith.constant 0 : i32
    return %c0_i32, %c0_i32_0 : i32, i32
  }
  func.func @transform_19(%arg0: i32) -> (i32, i32) {
    %c0_i32 = arith.constant 0 : i32
    %c0_i32_0 = arith.constant 0 : i32
    %c0_i32_1 = arith.constant 0 : i32
    return %c0_i32, %c0_i32_0 : i32, i32
  }
  func.func @transform_20(%arg0: i32) -> (i32, i32, i32) {
    %c0_i32 = arith.constant 0 : i32
    %c0_i32_0 = arith.constant 0 : i32
    %c0_i32_1 = arith.constant 0 : i32
    return %arg0, %c0_i32, %c0_i32_0 : i32, i32, i32
  }
}

</mosaic_0001>

<bundles_post_ra>
// kernel: mini_transformer_forward.1
= control target key start
LH: loop header
LB: loop body
LE: loop exit
PB: predicated region body
PF: predicated region fallthrough
CT: control target
= control target key end

     0   :  { %s4691_s0 = inlined_call_operand.vmem [shape: f32[2,8,16], index: 0, kind: input, shape index: {}]   ;;  %s4692_s1 = inlined_call_operand.vmem [shape: f32[8,32], index: 1, kind: input, shape index: {}]   ;;  %s4693_s2 = inlined_call_operand.vmem [shape: bf16[16,32], index: 2, kind: input, shape index: {}]   ;;  %s4694_s3 = inlined_call_operand.vmem [shape: f32[1,32], index: 3, kind: input, shape index: {}]   ;;  %s4695_s4 = inlined_call_operand.hbm [shape: f32[1,32], index: 4, kind: input, shape index: {}]   ;;  %s4696_s5 = inlined_call_operand.hbm [shape: f32[1,32], index: 5, kind: input, shape index: {}]   ;;  %s4697_s6 = inlined_call_operand.vmem [shape: bf16[2,32,96], index: 6, kind: input, shape index: {}]   ;;  %s4698_s7 = inlined_call_operand.hbm [shape: f32[2,1,96], index: 7, kind: input, shape index: {}]   ;;  %s4699_s8 = inlined_call_operand.vmem [shape: bf16[2,32,32], index: 8, kind: input, shape index: {}]   ;;  %s4700_s9 = inlined_call_operand.hbm [shape: f32[2,1,32], index: 9, kind: input, shape index: {}]   ;;  %s4701_s10 = inlined_call_operand.hbm [shape: f32[2,1,32], index: 10, kind: input, shape index: {}]   ;;  %s4702_s11 = inlined_call_operand.hbm [shape: f32[2,1,32], index: 11, kind: input, shape index: {}]   ;;  %s4703_s12 = inlined_call_operand.vmem [shape: bf16[2,32,64], index: 12, kind: input, shape index: {}]   ;;  %s4704_s13 = inlined_call_operand.hbm [shape: f32[2,1,64], index: 13, kind: input, shape index: {}]   ;;  %s4705_s14 = inlined_call_operand.vmem [shape: bf16[2,64,32], index: 14, kind: input, shape index: {}]   ;;  %s4706_s15 = inlined_call_operand.hbm [shape: f32[2,1,32], index: 15, kind: input, shape index: {}]   ;;  %s4707_s16 = inlined_call_operand.hbm [shape: f32[2,1,32], index: 16, kind: input, shape index: {}]   ;;  %s4708_s17 = inlined_call_operand.hbm [shape: f32[2,1,32], index: 17, kind: input, shape index: {}]   ;;  %s4709_s18 = inlined_call_operand.hbm [shape: bf16[32,128], index: 18, kind: input, shape index: {}]   ;;  %s4710_s19 = inlined_call_operand.hbm [shape: f32[1,128], index: 19, kind: input, shape index: {}]   ;;  %s4711_s20 = inlined_call_operand.hbm [shape: f32[2,8,128], index: 20, kind: output, shape index: {}]  }
   0x1   :  { %4727 = sst [smem:[#allocation39_spill]] %s4691_s0 }
   0x2   :  { %4728 = sst [smem:[#allocation40_spill]] %s4692_s1 }
   0x3   :  { %4729 = sst [smem:[#allocation41_spill]] %s4693_s2 }
   0x4   :  { %4730 = sst [smem:[#allocation42_spill]] %s4694_s3 }
   0x5   :  { %4731 = sst [smem:[#allocation43_spill]] %s4695_s4 }
   0x6   :  { %4732 = sst [smem:[#allocation44_spill]] %s4696_s5 }
   0x7   :  { %4733 = sst [smem:[#allocation45_spill]] %s4700_s9 }
   0x8   :  { %4734 = sst [smem:[#allocation46_spill]] %s4702_s11 }
   0x9   :  { %4735 = sst [smem:[#allocation47_spill]] %s4705_s14 }
   0xa   :  { %4736 = sst [smem:[#allocation48_spill]] %s4706_s15 }
   0xb   :  { %4737 = sst [smem:[#allocation49_spill]] %s4711_s20 }
   0xc   :  { %25 = vsyncpa [#allocation3], 0 }
   0xd   :  { %26 = vsyncpa [#allocation6], 0 }
   0xe   :  { %27 = vsyncpa [#allocation9], 0 }
   0xf   :  { %28 = vsyncpa [#allocation12], 0 }
  0x10   :  { %29 = vsyncpa [#allocation15], 0 }
  0x11   :  { %30 = vsyncpa [#allocation18], 0 }
  0x12   :  { %31 = vsyncpa [#allocation21], 0 }
  0x13   :  { %32 = vsyncpa [#allocation4], 0 }
  0x14   :  { %34 = vsyncpa [#allocation4 + $0x1], 0  ;;  %s3982_s1 = smov 0   ;;  %s3984_s22 = smov 0  }
  0x15   :  { %s3986_s23 = smov 0   ;;  %s3988_s24 = smov 0  }
  0x16 LB: > { %4738 = sst [smem:[#allocation31_spill]] %s3836_s1  ;;  %s4003_s2 = sadd.s32 4294967295, %s3848_s24   ;;  %s3848_s24 = sphi %s3988_s24, %s4786_s24   ;;  %s3844_s23 = sphi %s3986_s23, %s4789_s23   ;;  %s3840_s22 = sphi %s3984_s22, %s4788_s22   ;;  %s3836_s1 = sphi %s3982_s1, %s4787_s1  }
  0x17   : > { %4739 = sst [smem:[#allocation32_spill]] %s3840_s22  ;;  %s2813_s25 = sadd.s32 4294967294, %s3848_s24  }
  0x18   : > { %4740 = sst [smem:[#allocation33_spill]] %s3844_s23  ;;  %s4007_s3 = sadd.s32 1, %s3848_s24  }
  0x19   : > { %4741 = sst [smem:[#allocation34_spill]] %s3848_s24  ;;  %s472_s26 = sadd.s32 1, %s3844_s23 }
  0x1a   : > { %4742 = sst [smem:[#allocation35_spill]] %s4007_s3  ;;  %s469_s27 = ssub.s32 %s3848_s24, %s4007_s3 }
  0x1b   : > { %p482_p0 = scmp.ne.s32.totalorder %s3844_s23, %s3840_s22  ;;  %p470_p1 = scmp.eq.s32.totalorder %s469_s27, 0 }
  0x1c   : > { %p483_p2 = scmp.eq.s32.totalorder %s4003_s2, 1  ;;  %p488_p3 = scmp.ne.s32.totalorder %s3840_s22, %s3836_s1 }
  0x1d   : > { %p489_p4 = scmp.eq.s32.totalorder %s2813_s25, 1  ;;  %p2814_p7 = scmp.ge.s32.totalorder %s3848_s24, 1 }
  0x1e   : > { %s4018_s28 = scalar_select %p470_p1, %s3844_s23, %s472_s26  }
  0x1f   : > { %p4020_p5 = por %p483_p2, %p482_p0  ;;  %p4024_p6 = por %p489_p4, %p488_p3 }
  0x20   : > { %4743 = sst [smem:[#allocation36_spill]] %s4018_s28  ;;  %p496_p8 = scmp.lt.s32.totalorder %s3848_s24, 3 }
  0x21   : > { %s4744_s4 = scalar_select %p4020_p5, 1, 0 }
  0x22   : > { %s4746_s29 = scalar_select %p4024_p6, 1, 0 }
  0x23   : > { %4745 = sst [smem:[#allocation37_spill]] %s4744_s4  ;;  %p4720_p9 = scmp.eq.s32.totalorder %s4003_s2, 0 }
  0x24   : > { %4747 = sst [smem:[#allocation38_spill]] %s4746_s29  ;;  %p4031_p10 = pnand %p2814_p7, %p496_p8 }
  0x25   : > { %s3850_s0 = smov [#allocation5]   ;;  %s3851_s26 = smov [#allocation8]  }
  0x26   : > { %s4748_s30 = scalar_select %p4031_p10, 1, 0 }
  0x27   : > { %s529_s21 = sshll.u32 %s3850_s0, 4  ;;  %p3233_p11 = pneg %p4031_p10  ;;  %s530_s21 = int_to_ptr.vmem [resolvable:$true] %s529_s21 }
  0x28   : > { %s558_s27 = sshll.u32 %s3851_s26, 4  ;;  %s3852_s28 = smov [#allocation11]   ;;  %s4043_s27 = int_to_ptr.vmem [resolvable:$true] %s558_s27 }
  0x29   : > { %p4039_p12 = pnand %p4720_p9, %p3233_p11  ;;  %s4045_s23 = sshll.u32 %s3852_s28, 4  ;;  %s585_s23 = int_to_ptr.vmem [resolvable:$true] %s4045_s23 }
  0x2a   : > { %s4750_s5 = sld [smem:[#allocation44_spill]] }
  0x2b   : > { %p4055_p0 = pneg %p4039_p12 }
  0x30   : > { %s3422_s0 = scalar_lea.hbm %s4750_s5, 16 }
  0x31   : > { %p3423_p13 = scmp.ne.s32.totalorder %s4750_s5, %s3422_s0  ;;  %p3429_p3 = scmp.lt.u32.totalorder %s3422_s0, %s4750_s5 }
  0x33   : > { %p3425_p1 = pnand %p4055_p0, %p3423_p13 }
  0x35   : > { %p3426_p2 = pneg %p3425_p1 }
  0x37   : > { %p3431_p4 = pnand %p3429_p3, %p3426_p2 }
  0x39   : > { %3434 = shalt.err (!%p3431_p4)
}
  0x3a   : > { %s3435_s3 = scalar_lea.vmem %s530_s21, 16  ;;  %s3442_s1 = scalar_lea.vmem %s530_s21, 32 }
  0x3b   : > { %p3436_p7 = scmp.ne.s32.totalorder %s530_s21, %s3435_s3  ;;  %p3443_p9 = scmp.lt.s32.totalorder %s530_s21, %s530_s21 }
  0x3c   : > { %p3444_p6 = scmp.lt.s32.totalorder %s3442_s1, %s3435_s3 }
  0x3d   : > { %p3438_p8 = pnand %p3436_p7, %p4055_p0 }
  0x3e   : > { %p3445_p5 = por %p3444_p6, %p3443_p9 }
  0x3f   : > { %p3439_p11 = pneg %p3438_p8 }
  0x41   : > { %p3446_p10 = pnand %p3445_p5, %p3439_p11 }
  0x43   : > { %3449 = shalt.err (!%p3446_p10)
}
  0x44   : > { %3239 = dma.hbm_to_vmem [thread:$0]  (!%p4039_p12), %s4750_s5, 16, %s530_s21, [#allocation6]  }
  0x45   : > { %s4752_s9 = sld [smem:[#allocation45_spill]] }
  0x4b   : > { %s3450_s28 = scalar_lea.hbm %s4752_s9, 32 }
  0x4c   : > { %p3451_p13 = scmp.ne.s32.totalorder %s4752_s9, %s3450_s28  ;;  %p3457_p5 = scmp.lt.u32.totalorder %s3450_s28, %s4752_s9 }
  0x4e   : > { %p3453_p1 = pnand %p3451_p13, %p4055_p0 }
  0x50   : > { %p3454_p6 = pneg %p3453_p1 }
  0x52   : > { %p3459_p9 = pnand %p3457_p5, %p3454_p6 }
  0x54   : > { %3462 = shalt.err (!%p3459_p9)
}
  0x55   : > { %s3463_s21 = scalar_lea.vmem %s4043_s27, 32  ;;  %p3471_p4 = scmp.lt.s32.totalorder %s4043_s27, %s4043_s27 }
  0x56   : > { %p3464_p10 = scmp.ne.s32.totalorder %s4043_s27, %s3463_s21  ;;  %p3472_p7 = scmp.lt.s32.totalorder %s3463_s21, %s3463_s21 }
  0x58   : > { %p3466_p2 = pnand %p3464_p10, %p4055_p0  ;;  %p3473_p8 = por %p3472_p7, %p3471_p4 }
  0x5a   : > { %p3467_p3 = pneg %p3466_p2 }
  0x5c   : > { %p3474_p11 = pnand %p3473_p8, %p3467_p3 }
  0x5e   : > { %3477 = shalt.err (!%p3474_p11)
}
  0x5f   : > { %s3853_s22 = smov 16   ;;  %s3854_s4 = smov 1  }
  0x60   : > { %3245 = dma.hbm_to_vmem [thread:$0]  (!%p4039_p12), %s4752_s9, 32, %s4043_s27, [#allocation9], %s3853_s22, %s3853_s22, %s3854_s4  }
  0x61   : > { %s4753_s11 = sld [smem:[#allocation46_spill]] }
  0x67   : > { %s3478_s28 = scalar_lea.hbm %s4753_s11, 32 }
  0x68   : > { %p3479_p13 = scmp.ne.s32.totalorder %s4753_s11, %s3478_s28  ;;  %p3485_p5 = scmp.lt.u32.totalorder %s3478_s28, %s4753_s11 }
  0x6a   : > { %p3481_p1 = pnand %p3479_p13, %p4055_p0 }
  0x6c   : > { %p3482_p6 = pneg %p3481_p1 }
  0x6e   : > { %p3487_p9 = pnand %p3485_p5, %p3482_p6 }
  0x70   : > { %3490 = shalt.err (!%p3487_p9)
}
  0x71   : > { %s3491_s24 = scalar_lea.vmem %s585_s23, 32  ;;  %p3499_p4 = scmp.lt.s32.totalorder %s585_s23, %s585_s23 }
  0x72   : > { %p3492_p10 = scmp.ne.s32.totalorder %s585_s23, %s3491_s24  ;;  %p3500_p7 = scmp.lt.s32.totalorder %s3491_s24, %s3491_s24 }
  0x74   : > { %p3494_p2 = pnand %p3492_p10, %p4055_p0  ;;  %p3501_p8 = por %p3500_p7, %p3499_p4 }
  0x76   : > { %p3495_p3 = pneg %p3494_p2 }
  0x78   : > { %p3502_p11 = pnand %p3501_p8, %p3495_p3 }
  0x7a   : > { %3505 = shalt.err (!%p3502_p11)
}
  0x7b   : > { %3251 = dma.hbm_to_vmem [thread:$0]  (!%p4039_p12), %s4753_s11, 32, %s585_s23, [#allocation12], %s3853_s22, %s3853_s22, %s3854_s4  }
  0x7c   : > { %s3855_s29 = smov [#allocation14]   ;;  %s3856_s26 = smov [#allocation17]  }
  0x7d   : > { %s616_s0 = sshll.u32 %s3855_s29, 4  ;;  %s642_s28 = sshll.u32 %s3856_s26, 4  ;;  %s617_s0 = int_to_ptr.vmem [resolvable:$true] %s616_s0  ;;  %s643_s28 = int_to_ptr.vmem [resolvable:$true] %s642_s28 }
  0x7e   : > { %s4754_s15 = sld [smem:[#allocation48_spill]] }
  0x84   : > { %s3506_s21 = scalar_lea.hbm %s4754_s15, 32 }
  0x85   : > { %p3507_p13 = scmp.ne.s32.totalorder %s4754_s15, %s3506_s21  ;;  %p3513_p5 = scmp.lt.u32.totalorder %s3506_s21, %s4754_s15 }
  0x87   : > { %p3509_p1 = pnand %p3507_p13, %p4055_p0 }
  0x89   : > { %p3510_p6 = pneg %p3509_p1 }
  0x8b   : > { %p3515_p9 = pnand %p3513_p5, %p3510_p6 }
  0x8d   : > { %3518 = shalt.err (!%p3515_p9)
}
  0x8e   : > { %s3519_s23 = scalar_lea.vmem %s617_s0, 32  ;;  %p3527_p4 = scmp.lt.s32.totalorder %s617_s0, %s617_s0 }
  0x8f   : > { %p3520_p10 = scmp.ne.s32.totalorder %s617_s0, %s3519_s23  ;;  %p3528_p7 = scmp.lt.s32.totalorder %s3519_s23, %s3519_s23 }
  0x91   : > { %p3522_p2 = pnand %p3520_p10, %p4055_p0  ;;  %p3529_p8 = por %p3528_p7, %p3527_p4 }
  0x93   : > { %p3523_p3 = pneg %p3522_p2 }
  0x95   : > { %p3530_p11 = pnand %p3529_p8, %p3523_p3 }
  0x97   : > { %3533 = shalt.err (!%p3530_p11)
}
  0x98   : > { %3257 = dma.hbm_to_vmem [thread:$0]  (!%p4039_p12), %s4754_s15, 32, %s617_s0, [#allocation15], %s3853_s22, %s3853_s22, %s3854_s4  }
  0x99   : > { %s3534_s26 = scalar_lea.hbm %s4708_s17, 32 }
  0x9a   : > { %p3535_p13 = scmp.ne.s32.totalorder %s4708_s17, %s3534_s26  ;;  %p3541_p5 = scmp.lt.u32.totalorder %s3534_s26, %s4708_s17 }
  0x9c   : > { %p3537_p1 = pnand %p3535_p13, %p4055_p0 }
  0x9e   : > { %p3538_p6 = pneg %p3537_p1 }
  0xa0   : > { %p3543_p9 = pnand %p3541_p5, %p3538_p6 }
  0xa2   : > { %3546 = shalt.err (!%p3543_p9)
}
  0xa3   : > { %s3547_s5 = scalar_lea.vmem %s643_s28, 32  ;;  %p3555_p4 = scmp.lt.s32.totalorder %s643_s28, %s643_s28 }
  0xa4   : > { %p3548_p10 = scmp.ne.s32.totalorder %s643_s28, %s3547_s5  ;;  %p3556_p7 = scmp.lt.s32.totalorder %s3547_s5, %s3547_s5 }
  0xa6   : > { %p3550_p2 = pnand %p3548_p10, %p4055_p0  ;;  %p3557_p8 = por %p3556_p7, %p3555_p4 }
  0xa8   : > { %p3551_p3 = pneg %p3550_p2 }
  0xaa   : > { %p3558_p11 = pnand %p3557_p8, %p3551_p3 }
  0xac   : > { %3561 = shalt.err (!%p3558_p11)
}
  0xad   : > { %3263 = dma.hbm_to_vmem [thread:$0]  (!%p4039_p12), %s4708_s17, 32, %s643_s28, [#allocation18], %s3853_s22, %s3853_s22, %s3854_s4  }
  0xae   : > { %s3857_s9 = smov [#allocation2]   ;;  %s3858_s27 = smov [#allocation7]  }
  0xaf   : > { %s518_s14 = sshll.u32 %s3857_s9, 4  ;;  %s542_s29 = sshll.u32 %s3858_s27, 4  ;;  %s519_s14 = int_to_ptr.vmem [resolvable:$true] %s518_s14  ;;  %s543_s29 = int_to_ptr.vmem [resolvable:$true] %s542_s29 }
  0xb0   : > { %s4755_s1 = sld [smem:[#allocation43_spill]] }
  0xb6   : > { %s4756_s21 = smov %s4755_s1  ;;  %s3562_s24 = scalar_lea.hbm %s4755_s1, 16 }
  0xb7   : > { %p3563_p13 = scmp.ne.s32.totalorder %s4756_s21, %s3562_s24  ;;  %p3569_p5 = scmp.lt.u32.totalorder %s3562_s24, %s4756_s21 }
  0xb9   : > { %p3565_p1 = pnand %p3563_p13, %p4055_p0 }
  0xbb   : > { %p3566_p6 = pneg %p3565_p1 }
  0xbd   : > { %p3571_p9 = pnand %p3569_p5, %p3566_p6 }
  0xbf   : > { %3574 = shalt.err (!%p3571_p9)
}
  0xc0   : > { %s3575_s28 = scalar_lea.vmem %s519_s14, 16  ;;  %s3582_s23 = scalar_lea.vmem %s519_s14, 32 }
  0xc1   : > { %p3576_p10 = scmp.ne.s32.totalorder %s519_s14, %s3575_s28  ;;  %p3583_p4 = scmp.lt.s32.totalorder %s519_s14, %s519_s14 }
  0xc2   : > { %p3584_p7 = scmp.lt.s32.totalorder %s3582_s23, %s3575_s28 }
  0xc3   : > { %p3578_p2 = pnand %p3576_p10, %p4055_p0 }
  0xc4   : > { %p3585_p8 = por %p3584_p7, %p3583_p4 }
  0xc5   : > { %p3579_p3 = pneg %p3578_p2 }
  0xc7   : > { %p3586_p11 = pnand %p3585_p8, %p3579_p3 }
  0xc9   : > { %3589 = shalt.err (!%p3586_p11)
}
  0xca   : > { %3236 = dma.hbm_to_vmem [thread:$0]  (!%p4039_p12), %s4756_s21, 16, %s519_s14, [#allocation3]  }
  0xcb   : > { %s3590_s26 = scalar_lea.hbm %s4698_s7, 32 }
  0xcc   : > { %p3591_p13 = scmp.ne.s32.totalorder %s4698_s7, %s3590_s26  ;;  %p3597_p5 = scmp.lt.u32.totalorder %s3590_s26, %s4698_s7 }
  0xce   : > { %p3593_p1 = pnand %p3591_p13, %p4055_p0 }
  0xd0   : > { %p3594_p6 = pneg %p3593_p1 }
  0xd2   : > { %p3599_p9 = pnand %p3597_p5, %p3594_p6 }
  0xd4   : > { %3602 = shalt.err (!%p3599_p9)
}
  0xd5   : > { %s3603_s0 = scalar_lea.vmem %s543_s29, 32  ;;  %p3611_p4 = scmp.lt.s32.totalorder %s543_s29, %s543_s29 }
  0xd6   : > { %p3604_p10 = scmp.ne.s32.totalorder %s543_s29, %s3603_s0  ;;  %p3612_p7 = scmp.lt.s32.totalorder %s3603_s0, %s3603_s0 }
  0xd8   : > { %p3606_p2 = pnand %p3604_p10, %p4055_p0  ;;  %p3613_p8 = por %p3612_p7, %p3611_p4 }
  0xda   : > { %p3607_p3 = pneg %p3606_p2 }
  0xdc   : > { %p3614_p11 = pnand %p3613_p8, %p3607_p3 }
  0xde   : > { %3617 = shalt.err (!%p3614_p11)
}
  0xdf   : > { %3242 = dma.hbm_to_vmem [thread:$0]  (!%p4039_p12), %s4698_s7, 32, %s543_s29, [#allocation6], %s3853_s22, %s3853_s22, %s3854_s4  }
  0xe0   : > { %s3859_s23 = smov [#allocation10]   ;;  %s3860_s9 = smov [#allocation13]  }
  0xe1   : > { %s571_s11 = sshll.u32 %s3859_s23, 4  ;;  %s600_s15 = sshll.u32 %s3860_s9, 4  ;;  %s572_s11 = int_to_ptr.vmem [resolvable:$true] %s571_s11  ;;  %s601_s15 = int_to_ptr.vmem [resolvable:$true] %s600_s15 }
  0xe2   : > { %s3618_s3 = scalar_lea.hbm %s4701_s10, 32 }
  0xe3   : > { %p3619_p13 = scmp.ne.s32.totalorder %s4701_s10, %s3618_s3  ;;  %p3625_p5 = scmp.lt.u32.totalorder %s3618_s3, %s4701_s10 }
  0xe5   : > { %p3621_p1 = pnand %p3619_p13, %p4055_p0 }
  0xe7   : > { %p3622_p6 = pneg %p3621_p1 }
  0xe9   : > { %p3627_p9 = pnand %p3625_p5, %p3622_p6 }
  0xeb   : > { %3630 = shalt.err (!%p3627_p9)
}
  0xec   : > { %s3631_s29 = scalar_lea.vmem %s572_s11, 32  ;;  %p3639_p4 = scmp.lt.s32.totalorder %s572_s11, %s572_s11 }
  0xed   : > { %p3632_p10 = scmp.ne.s32.totalorder %s572_s11, %s3631_s29  ;;  %p3640_p7 = scmp.lt.s32.totalorder %s3631_s29, %s3631_s29 }
  0xef   : > { %p3634_p2 = pnand %p3632_p10, %p4055_p0  ;;  %p3641_p8 = por %p3640_p7, %p3639_p4 }
  0xf1   : > { %p3635_p3 = pneg %p3634_p2 }
  0xf3   : > { %p3642_p11 = pnand %p3641_p8, %p3635_p3 }
  0xf5   : > { %3645 = shalt.err (!%p3642_p11)
}
  0xf6   : > { %3248 = dma.hbm_to_vmem [thread:$0]  (!%p4039_p12), %s4701_s10, 32, %s572_s11, [#allocation9], %s3853_s22, %s3853_s22, %s3854_s4  }
  0xf7   : > { %s3646_s27 = scalar_lea.hbm %s4704_s13, 32 }
  0xf8   : > { %p3647_p13 = scmp.ne.s32.totalorder %s4704_s13, %s3646_s27  ;;  %p3653_p5 = scmp.lt.u32.totalorder %s3646_s27, %s4704_s13 }
  0xfa   : > { %p3649_p1 = pnand %p3647_p13, %p4055_p0 }
  0xfc   : > { %p3650_p6 = pneg %p3649_p1 }
  0xfe   : > { %p3655_p9 = pnand %p3653_p5, %p3650_p6 }
 0x100   : > { %3658 = shalt.err (!%p3655_p9)
}
 0x101   : > { %s3659_s5 = scalar_lea.vmem %s601_s15, 32  ;;  %p3667_p4 = scmp.lt.s32.totalorder %s601_s15, %s601_s15 }
 0x102   : > { %p3660_p10 = scmp.ne.s32.totalorder %s601_s15, %s3659_s5  ;;  %p3668_p7 = scmp.lt.s32.totalorder %s3659_s5, %s3659_s5 }
 0x104   : > { %p3662_p2 = pnand %p3660_p10, %p4055_p0  ;;  %p3669_p8 = por %p3668_p7, %p3667_p4 }
 0x106   : > { %p3663_p3 = pneg %p3662_p2 }
 0x108   : > { %p3670_p11 = pnand %p3669_p8, %p3663_p3 }
 0x10a   : > { %3673 = shalt.err (!%p3670_p11)
}
 0x10b   : > { %3254 = dma.hbm_to_vmem [thread:$0]  (!%p4039_p12), %s4704_s13, 32, %s601_s15, [#allocation12], %s3853_s22, %s3853_s22, %s3854_s4  }
 0x10c   : > { %s3861_s29 = smov [#allocation16]   ;;  %s3862_s28 = smov [#allocation19]  }
 0x10d   : > { %s629_s14 = sshll.u32 %s3861_s29, 4  ;;  %s655_s23 = sshll.u32 %s3862_s28, 4  ;;  %s630_s14 = int_to_ptr.vmem [resolvable:$true] %s629_s14  ;;  %s656_s23 = int_to_ptr.vmem [resolvable:$true] %s655_s23 }
 0x10e   : > { %s3674_s26 = scalar_lea.hbm %s4707_s16, 32 }
 0x10f   : > { %p3675_p13 = scmp.ne.s32.totalorder %s4707_s16, %s3674_s26  ;;  %p3681_p5 = scmp.lt.u32.totalorder %s3674_s26, %s4707_s16 }
 0x111   : > { %p3677_p1 = pnand %p3675_p13, %p4055_p0 }
 0x113   : > { %p3678_p6 = pneg %p3677_p1 }
 0x115   : > { %p3683_p9 = pnand %p3681_p5, %p3678_p6 }
 0x117   : > { %3686 = shalt.err (!%p3683_p9)
}
 0x118   : > { %s3687_s15 = scalar_lea.vmem %s630_s14, 32  ;;  %p3695_p4 = scmp.lt.s32.totalorder %s630_s14, %s630_s14 }
 0x119   : > { %p3688_p10 = scmp.ne.s32.totalorder %s630_s14, %s3687_s15  ;;  %p3696_p7 = scmp.lt.s32.totalorder %s3687_s15, %s3687_s15 }
 0x11b   : > { %p3690_p2 = pnand %p3688_p10, %p4055_p0  ;;  %p3697_p8 = por %p3696_p7, %p3695_p4 }
 0x11d   : > { %p3691_p3 = pneg %p3690_p2 }
 0x11f   : > { %p3698_p11 = pnand %p3697_p8, %p3691_p3 }
 0x121   : > { %3701 = shalt.err (!%p3698_p11)
}
 0x122   : > { %3260 = dma.hbm_to_vmem [thread:$0]  (!%p4039_p12), %s4707_s16, 32, %s630_s14, [#allocation15], %s3853_s22, %s3853_s22, %s3854_s4  }
 0x123   : > { %s3702_s9 = scalar_lea.hbm %s4709_s18, 256 }
 0x124   : > { %p3703_p13 = scmp.ne.s32.totalorder %s4709_s18, %s3702_s9  ;;  %p3709_p5 = scmp.lt.u32.totalorder %s3702_s9, %s4709_s18 }
 0x126   : > { %p3705_p1 = pnand %p3703_p13, %p4055_p0 }
 0x128   : > { %p3706_p6 = pneg %p3705_p1 }
 0x12a   : > { %p3711_p9 = pnand %p3709_p5, %p3706_p6 }
 0x12c   : > { %3714 = shalt.err (!%p3711_p9)
}
 0x12d   : > { %s3715_s24 = scalar_lea.vmem %s656_s23, 256  ;;  %p3723_p4 = scmp.lt.s32.totalorder %s656_s23, %s656_s23 }
 0x12e   : > { %p3716_p10 = scmp.ne.s32.totalorder %s656_s23, %s3715_s24  ;;  %p3724_p7 = scmp.lt.s32.totalorder %s3715_s24, %s3715_s24 }
 0x130   : > { %p3718_p2 = pnand %p3716_p10, %p4055_p0  ;;  %p3725_p8 = por %p3724_p7, %p3723_p4 }
 0x132   : > { %p3719_p3 = pneg %p3718_p2 }
 0x134   : > { %p3726_p11 = pnand %p3725_p8, %p3719_p3 }
 0x136   : > { %3729 = shalt.err (!%p3726_p11)
}
 0x137   : > { %s3863_s22 = smov 64   ;;  %s3864_s4 = smov 4  }
 0x138   : > { %3266 = dma.hbm_to_vmem [thread:$0]  (!%p4039_p12), %s4709_s18, 256, %s656_s23, [#allocation18], %s3863_s22, %s3863_s22, %s3864_s4  }
 0x139   : > { %s3865_s15 = smov [#allocation20]   ;;  %s3730_s28 = scalar_lea.hbm %s4710_s19, 16 }
 0x13a   : > { %s669_s11 = sshll.u32 %s3865_s15, 4  ;;  %p3731_p13 = scmp.ne.s32.totalorder %s4710_s19, %s3730_s28  ;;  %s670_s11 = int_to_ptr.vmem [resolvable:$true] %s669_s11 }
 0x13b   : > { %p3737_p5 = scmp.lt.u32.totalorder %s3730_s28, %s4710_s19 }
 0x13c   : > { %p3733_p1 = pnand %p3731_p13, %p4055_p0 }
 0x13e   : > { %p3734_p6 = pneg %p3733_p1 }
 0x140   : > { %p3739_p9 = pnand %p3737_p5, %p3734_p6 }
 0x142   : > { %3742 = shalt.err (!%p3739_p9)
}
 0x143   : > { %s3743_s23 = scalar_lea.vmem %s670_s11, 16  ;;  %s3750_s1 = scalar_lea.vmem %s670_s11, 32 }
 0x144   : > { %p3744_p10 = scmp.ne.s32.totalorder %s670_s11, %s3743_s23  ;;  %p3751_p4 = scmp.lt.s32.totalorder %s670_s11, %s670_s11 }
 0x145   : > { %p3752_p7 = scmp.lt.s32.totalorder %s3750_s1, %s3743_s23 }
 0x146   : > { %p3746_p2 = pnand %p3744_p10, %p4055_p0 }
 0x147   : > { %p3753_p8 = por %p3752_p7, %p3751_p4 }
 0x148   : > { %p3747_p3 = pneg %p3746_p2 }
 0x14a   : > { %p3754_p11 = pnand %p3753_p8, %p3747_p3 }
 0x14c   : > { %3757 = shalt.err (!%p3754_p11)
}
 0x14d   : > { %3269 = dma.hbm_to_vmem [thread:$0]  (!%p4039_p12), %s4710_s19, 16, %s670_s11, [#allocation21]  }
 0x14e   : > { %p4757_p13 = scmp.ne.s32.totalorder %s4748_s30, 0 }
 0x14f   : > { %p4758_p1 = scmp.eq.s32.totalorder (!%p4757_p13), %s4003_s2, 0 }
 0x150   : > { %689 = sbr.rel (%p4757_p13) target bundleno = 6334 (0x18be), region = 100 }
 0x157   : > { %3803 = dma.done.wait (%p4758_p1), [#allocation3], 16   ;;  %p4759_p0 = pmov %p4758_p1 }
 0x159   : > { %3805 = vsyncadd (%p4759_p0), [#allocation3], 4294967280  ;;  %p4760_p6 = pmov %p4759_p0 }
 0x15a   : > { %p4761_p5 = pmov %p4759_p0 }
 0x15b   : > { %3807 = dma.done.wait (%p4760_p6), [#allocation6], 48  }
 0x15c   : > { %3809 = vsyncadd (%p4761_p5), [#allocation6], 4294967248  ;;  %p4762_p9 = pmov %p4759_p0 }
 0x15d   : > { %p4763_p12 = pmov %p4759_p0 }
 0x15e   : > { %3811 = dma.done.wait (%p4762_p9), [#allocation9], 64  }
 0x15f   : > { %3813 = vsyncadd (%p4763_p12), [#allocation9], 4294967232  ;;  %p4764_p10 = pmov %p4759_p0 }
 0x160   : > { %p4765_p2 = pmov %p4759_p0 }
 0x161   : > { %3815 = dma.done.wait (%p4764_p10), [#allocation12], 64  }
 0x162   : > { %3817 = vsyncadd (%p4765_p2), [#allocation12], 4294967232  ;;  %p4766_p3 = pmov %p4759_p0 }
 0x163   : > { %p4767_p4 = pmov %p4759_p0 }
 0x164   : > { %3819 = dma.done.wait (%p4766_p3), [#allocation15], 64  }
 0x165   : > { %3821 = vsyncadd (%p4767_p4), [#allocation15], 4294967232  ;;  %p4768_p7 = pmov %p4759_p0 }
 0x166   : > { %p4769_p8 = pmov %p4759_p0 }
 0x167   : > { %3823 = dma.done.wait (%p4768_p7), [#allocation18], 288  }
 0x168   : > { %3825 = vsyncadd (%p4769_p8), [#allocation18], 4294967008  ;;  %p4770_p11 = pmov %p4759_p0 }
 0x169   : > { %p4771_p13 = pmov %p4759_p0 }
 0x16a   : > { %3827 = dma.done.wait (%p4770_p11), [#allocation21], 16  }
 0x16b   : > { %3829 = vsyncadd (%p4771_p13), [#allocation21], 4294967280  ;;  %p790_p1 = scmp.lt.s32.totalorder %s4003_s2, 1  ;;  %v3866_v0 = vmov 0.0   ;;  %vm3867_vm0 = vmmov 0   ;;  %s4772_s14 = sld [smem:[#allocation39_spill]] }
 0x16c   : > { %3001 = vmatprep.subr.bf16.mxu0 %v3866_v0  ;;  %3003 = vmatprep.mubr.msk.bf16.mxu0 %vm3867_vm0, %v3866_v0  ;;  %s4773_s0 = sld [smem:[#allocation41_spill]]  ;;  %vm812_vm1 = vcmask 130048   ;;  %s4774_s9 = sld [smem:[#allocation42_spill]]  ;;  %vm858_vm2 = vcmask 261120   ;;  %v3358_v16 = vld [vmem:[%s4697_s6] sm:$0xff]   ;;  %v3359_v17 = vld [vmem:[%s4697_s6 + $0x8] sm:$0xff]  }
 0x16d   : > { %s791_s20 = scalar_select %p790_p1, %s4003_s2, 1  ;;  %3007 = vmatprep.subr.bf16.mxu1 %v3866_v0  ;;  %3011 = vmatprep.mubr.msk.bf16.mxu1 %vm3867_vm0, %v3866_v0  ;;  %v2846_v22 = vld [vmem:[#allocation2] ss:$0 sm:$0xff]  ;;  %v2847_v24 = vld [vmem:[#allocation5] ss:$0 sm:$0xff]  ;;  %vm988_vm3 = vcmask 64512  }
 0x16e   : > { %3008 = vmatpush3.bf16.msra.mxu1 %v3358_v16  ;;  %s4775_s22 = sld [smem:[#allocation40_spill]]  ;;  %v2848_v30 = vld [vmem:[#allocation7] ss:$0 sm:$0xff]  ;;  %s3870_s25 = smov 112   ;;  %vm1235_vm4 = vcmask 1043456   ;;  %vm1437_vm5 = vcmask 195584  }
 0x16f   : > { %s2842_s30 = sshll.u32 %s791_s20, 3  ;;  %3009 = vmatprep.subr.bf16.mxu1 %v3866_v0  ;;  %s3868_s20 = smov 104   ;;  %vm1644_vm6 = vcmask 523264  }
 0x170   : > { %s3871_s4 = smov 96   ;;  %s3873_s29 = smov 8  }
 0x171   : > { %s793_s5 = scalar_lea.vmem %s4772_s14, %s2842_s30  ;;  %s3869_s30 = smov 120  }
 0x172   : > { %v3357_v1 = vld [vmem:[%s4773_s0] sm:$0xff]   ;;  %3010 = vmatpush3.bf16.msra.mxu1 %v3359_v17  ;;  %s3872_s14 = smov 64   ;;  %s3874_s28 = smov 16  }
 0x173   : > { %v795_v2 = vld [vmem:[%s793_s5] sm:$0xff]  ;;  %3002 = vmatpush3.bf16.msra.mxu0 %v3357_v1  ;;  %3021 = vmatprep.subr.bf16.mxu1 %v3866_v0  ;;  %s4778_s24 = sld [smem:[#allocation32_spill]]  ;;  %s3876_s0 = smov [#allocation22]  }
 0x174   : > { %v796_v3 = vpack.c.bf16 %v795_v2, %v795_v2  ;;  %3015 = vmatprep.subr.bf16.mxu0 %v3866_v0  ;;  %v2843_v4 = vld [vmem:[%s4774_s9] ss:$0 sm:$0xff]  ;;  %s3875_s9 = smov 24   ;;  %s3762_s27 = sshll.u32 %s3876_s0, 4  ;;  %s3763_s27 = int_to_ptr.vmem [resolvable:$false] %s3762_s27 }
 0x175   : > { %v887_v26 = vld [vmem:[%s4775_s22] sm:$0xff]  ;;  %s4776_s22 = sld [smem:[#allocation47_spill]]  ;;  %s3764_s26 = scalar_lea.vmem %s3763_s27, 256 }
 0x176   : > { %3004 = vmatmul.mubr.msk.bf16.vlgmr.msra.gmra.mrb[0].mxu0 %vm812_vm1, %v796_v3 }
 0x177   : > { %3017 = vmatprep.mubr.msk.bf16.mxu0 %vm3867_vm0, %v3866_v0 }
 0x17b   : > { %s4777_s5 = smov %s4776_s22 }
 0x249   : > { %v850_v5 = vpop.f32.mrb[0].mxu0 }
 0x24a   : > { %v851_v6 = vadd.f32 %v2843_v4, %v850_v5  ;;  %v3005_v7 = vpop.f32.mrb[1].mxu0 }
 0x24b   : > { %v853_v8 = vpop.f32.mrb[2].mxu0 }
 0x24c   : > { %v3006_v9 = vpop.f32.mrb[3].mxu0  ;;  %v859_v10 = vsel %vm858_vm2, %v851_v6, 0.0 }
 0x24d   : > { %860 = vadd.xlane.f32.xlu0 %v859_v10 }
 0x2da   : > { %v861_v11 = vpop.xlane.xlu0 %860 }
 0x2db   : > { %v863_v12 = vmul.f32 0.03125, %v861_v11 }
 0x2dd   : > { %v864_v13 = vsub.f32 %v851_v6, %v863_v12 }
 0x2df   : > { %v865_v14 = vmul.f32 %v864_v13, %v864_v13 }
 0x2e1   : > { %v866_v15 = vsel %vm858_vm2, %v865_v14, 0.0 }
 0x2e2   : > { %867 = vadd.xlane.f32.xlu0 %v866_v15 }
 0x36f   : > { %v868_v18 = vpop.xlane.xlu0 %867 }
 0x370   : > { %v869_v19 = vmul.f32 0.03125, %v868_v18 }
 0x372   : > { %v870_v20 = vadd.f32 1e-05, %v869_v19 }
 0x374   : > { %3380 = vrsqrt.f32 %v870_v20 }
 0x37e   : > { %v3381_v21 = vpop.eup %3380 }
 0x37f   : > { %v872_v23 = vmul.f32 %v3381_v21, %v864_v13 }
 0x381   : > { %v879_v25 = vmul.f32 %v2846_v22, %v872_v23 }
 0x383   : > { %v886_v27 = vadd.f32 %v2847_v24, %v879_v25 }
 0x385   : > { %v4363_v28 = vadd.f32 %v887_v26, %v886_v27 }
 0x387   : > { %v889_v29 = vpack.c.bf16 %v4363_v28, %v4363_v28 }
 0x389   : > { %3012 = vmatmul.mubr.msk.bf16.vlgmr.msra.gmra.mrb[0].mxu1 %vm858_vm2, %v889_v29 }
 0x38a   : > { %3023 = vmatprep.mubr.msk.bf16.mxu1 %vm3867_vm0, %v3866_v0 }
 0x45c   : > { %v950_v31 = vpop.f32.mrb[0].mxu1 }
 0x45d   : > { %v951_v32 = vadd.f32 %v2848_v30, %v950_v31  ;;  %v3013_v33 = vpop.f32.mrb[1].mxu1 }
 0x45e   : > { %v953_v34 = vpop.f32.mrb[2].mxu1 }
 0x45f   : > { %978 = vrot.lane.b32.xlu0 %v951_v32, %s3868_s20  ;;  %972 = vrot.lane.b32.xlu1 %v951_v32, %s3869_s30  ;;  %v3014_v35 = vpop.f32.mrb[3].mxu1  ;;  %v956_v36 = vmul.f32 0.35355338, %v951_v32  ;;  %v4374_v37 = vpack.c.bf16 %v951_v32, %v951_v32 }
 0x461   : > { %v967_v46 = vpack.c.bf16 %v956_v36, %v956_v36 }
 0x463   : > { %975 = vrot.lane.b32.xlu1 %v951_v32, %s3870_s25  ;;  %964 = vrot.lane.b32.xlu0 %v956_v36, %s3868_s20 }
 0x467   : > { %986 = vrot.lane.b32.xlu1 %v4374_v37, %s3871_s4 }
 0x46b   : > { %958 = vrot.lane.b32.xlu1 %v956_v36, %s3869_s30 }
 0x4d1   : > { %v973_v38 = vpop.permute.xlu1 %972  ;;  %v979_v42 = vpop.permute.xlu0 %978 }
 0x4d2   : > { %v4379_v39 = vpack.c.bf16 %v973_v38, %v973_v38  ;;  %v4387_v44 = vpack.c.bf16 %v979_v42, %v979_v42 }
 0x4d4   : > { %1036 = vrot.lane.b32.xlu1 %v4379_v39, %s3871_s4 }
 0x4d5   : > { %v976_v40 = vpop.permute.xlu1 %975  ;;  %v965_v55 = vpop.permute.xlu0 %964 }
 0x4d6   : > { %v4383_v41 = vpack.c.bf16 %v976_v40, %v976_v40  ;;  %v970_v58 = vpack.c.bf16 %v965_v55, %v965_v55 }
 0x4d8   : > { %1085 = vrot.lane.b32.xlu1 %v4383_v41, %s3871_s4 }
 0x4d9   : > { %v987_v43 = vpop.permute.xlu1 %986 }
 0x4da   : > { %v993_v45 = vsel %vm988_vm3, %v987_v43, 0 }
 0x4db   : > { %3016 = vmatpush3.bf16.xpose.msra.mxu0 %v993_v45 }
 0x4dc   : > { %1134 = vrot.lane.b32.xlu1 %v4387_v44, %s3871_s4  ;;  %3027 = vmatprep.subr.bf16.mxu0 %v3866_v0 }
 0x4dd   : > { %v959_v47 = vpop.permute.xlu1 %958 }
 0x4de   : > { %v968_v52 = vpack.c.bf16 %v959_v47, %v959_v47 }
 0x4e0   : > { %961 = vrot.lane.b32.xlu1 %v956_v36, %s3870_s25 }
 0x4e2   : > { %3018 = vmatmul.mubr.msk.bf16.vlgmr.msra.gmra.mrb[4].mxu0 %vm988_vm3, %v967_v46 }
 0x4e3   : > { %3029 = vmatprep.mubr.msk.bf16.mxu0 %vm3867_vm0, %v3866_v0 }
 0x546   : > { %v1037_v48 = vpop.permute.xlu1 %1036 }
 0x547   : > { %v1042_v49 = vsel %vm988_vm3, %v1037_v48, 0 }
 0x548   : > { %3022 = vmatpush3.bf16.xpose.msra.mxu1 %v1042_v49 }
 0x549   : > { %3033 = vmatprep.subr.bf16.mxu1 %v3866_v0 }
 0x54a   : > { %v1086_v50 = vpop.permute.xlu1 %1085 }
 0x54b   : > { %v1091_v51 = vsel %vm988_vm3, %v1086_v50, 0 }
 0x54c   : > { %3028 = vmatpush3.bf16.xpose.msra.mxu0 %v1091_v51 }
 0x54d   : > { %3039 = vmatprep.subr.bf16.mxu0 %v3866_v0 }
 0x54e   : > { %v1135_v53 = vpop.permute.xlu1 %1134 }
 0x54f   : > { %v1140_v54 = vsel %vm988_vm3, %v1135_v53, 0  ;;  %3024 = vmatmul.mubr.msk.bf16.vlgmr.msra.gmra.mrb[4].mxu1 %vm988_vm3, %v968_v52 }
 0x550   : > { %3034 = vmatpush3.bf16.xpose.msra.mxu1 %v1140_v54  ;;  %3035 = vmatprep.mubr.msk.bf16.mxu1 %vm3867_vm0, %v3866_v0 }
 0x551   : > { %3045 = vmatprep.subr.bf16.mxu1 %v3866_v0 }
 0x552   : > { %v962_v56 = vpop.permute.xlu1 %961 }
 0x553   : > { %v969_v57 = vpack.c.bf16 %v962_v56, %v962_v56 }
 0x555   : > { %3030 = vmatmul.mubr.msk.bf16.vlgmr.msra.gmra.mrb[8].mxu0 %vm988_vm3, %v969_v57 }
 0x556   : > { %3041 = vmatprep.mubr.msk.bf16.mxu0 %vm3867_vm0, %v3866_v0 }
 0x557   : > { %3036 = vmatmul.mubr.msk.bf16.vlgmr.msra.gmra.mrb[8].mxu1 %vm988_vm3, %v970_v58 }
 0x558   : > { %3047 = vmatprep.mubr.msk.bf16.mxu1 %vm3867_vm0, %v3866_v0 }
 0x5b5   : > { %v1029_v59 = vpop.f32.mrb[4].mxu0 }
 0x5b6   : > { %v3019_v60 = vpop.f32.mrb[5].mxu0  ;;  %v1182_v61 = vsel %vm988_vm3, %v1029_v59, -inf }
 0x5b7   : > { %1183 = vmax.xlane.f32.xlu1 %v1182_v61  ;;  %v1032_v62 = vpop.f32.mrb[6].mxu0 }
 0x5b8   : > { %v3020_v63 = vpop.f32.mrb[7].mxu0 }
 0x622   : > { %v1078_v1 = vpop.f32.mrb[4].mxu1 }
 0x623   : > { %v3025_v2 = vpop.f32.mrb[5].mxu1  ;;  %v1185_v3 = vsel %vm988_vm3, %v1078_v1, -inf }
 0x624   : > { %1186 = vmax.xlane.f32.xlu0 %v1185_v3  ;;  %v1081_v4 = vpop.f32.mrb[6].mxu1  ;;  %v3360_v2 = vld [vmem:[%s4699_s8] sm:$0xff]   ;;  %v3361_v3 = vld [vmem:[%s4699_s8 + $0x8] sm:$0xff]  }
 0x625   : > { %v3026_v5 = vpop.f32.mrb[7].mxu1 }
 0x628   : > { %v1127_v6 = vpop.f32.mrb[8].mxu0 }
 0x629   : > { %v3031_v7 = vpop.f32.mrb[9].mxu0  ;;  %v1188_v8 = vsel %vm988_vm3, %v1127_v6, -inf }
 0x62a   : > { %v1176_v9 = vpop.f32.mrb[8].mxu1  ;;  %1189 = vmax.xlane.f32.xlu0 %v1188_v8  ;;  %v1130_v10 = vpop.f32.mrb[10].mxu0 }
 0x62b   : > { %v3032_v11 = vpop.f32.mrb[11].mxu0  ;;  %v3037_v12 = vpop.f32.mrb[9].mxu1  ;;  %v1191_v13 = vsel %vm988_vm3, %v1176_v9, -inf }
 0x62c   : > { %v1179_v14 = vpop.f32.mrb[10].mxu1  ;;  %1192 = vmax.xlane.f32.xlu1 %v1191_v13 }
 0x62d   : > { %v3038_v15 = vpop.f32.mrb[11].mxu1 }
 0x63d   : > { %1279 = vrot.lane.b32.xlu1 %v4379_v39, %s3872_s14 }
 0x640   : > { %1230 = vrot.lane.b32.xlu0 %v4374_v37, %s3872_s14 }
 0x644   : > { %v1184_v16 = vpop.xlane.xlu1 %1183 }
 0x645   : > { %v1194_v17 = vsub.f32 %v1029_v59, %v1184_v16 }
 0x647   : > { %v1198_v18 = vmul.f32 1.442695, %v1194_v17 }
 0x649   : > { %3382 = vpow2.f32 %v1198_v18 }
 0x653   : > { %v3383_v19 = vpop.eup %3382 }
 0x654   : > { %v1206_v20 = vsel %vm988_vm3, %v3383_v19, 0.0 }
 0x65f   : > { %1207 = vadd.xlane.f32.xlu0 %v1206_v20 }
 0x6b1   : > { %v1187_v21 = vpop.xlane.xlu0 %1186 }
 0x6b2   : > { %v1195_v22 = vsub.f32 %v1078_v1, %v1187_v21 }
 0x6b4   : > { %v1200_v23 = vmul.f32 1.442695, %v1195_v22 }
 0x6b6   : > { %3384 = vpow2.f32 %v1200_v23  ;;  %v2860_v23 = vld [vmem:[#allocation8] ss:$0 sm:$0xff] }
 0x6b7   : > { %v1190_v24 = vpop.xlane.xlu0 %1189 }
 0x6b8   : > { %v1196_v25 = vsub.f32 %v1127_v6, %v1190_v24 }
 0x6b9   : > { %v1193_v26 = vpop.xlane.xlu1 %1192 }
 0x6ba   : > { %v1202_v27 = vmul.f32 1.442695, %v1196_v25  ;;  %v1197_v29 = vsub.f32 %v1176_v9, %v1193_v26 }
 0x6bb   : > { %v1231_v30 = vpop.permute.xlu0 %1230 }
 0x6bc   : > { %3386 = vpow2.f32 %v1202_v27  ;;  %v1204_v31 = vmul.f32 1.442695, %v1197_v29  ;;  %v1237_v32 = vsel %vm1235_vm4, %v1231_v30, 0 }
 0x6bd   : > { %v1280_v33 = vpop.permute.xlu1 %1279  ;;  %3040 = vmatpush3.bf16.msra.mxu0 %v1237_v32 }
 0x6be   : > { %3388 = vpow2.f32 %v1204_v31  ;;  %v1285_v34 = vsel %vm1235_vm4, %v1280_v33, 0  ;;  %3051 = vmatprep.subr.bf16.mxu0 %v3866_v0 }
 0x6bf   : > { %3046 = vmatpush3.bf16.msra.mxu1 %v1285_v34 }
 0x6c0   : > { %v3385_v35 = vpop.eup %3384  ;;  %3057 = vmatprep.subr.bf16.mxu1 %v3866_v0 }
 0x6c1   : > { %v1209_v36 = vsel %vm988_vm3, %v3385_v35, 0.0 }
 0x6c2   : > { %1210 = vadd.xlane.f32.xlu1 %v1209_v36 }
 0x6c6   : > { %v3387_v37 = vpop.eup %3386 }
 0x6c7   : > { %v1212_v38 = vsel %vm988_vm3, %v3387_v37, 0.0 }
 0x6c8   : > { %v3389_v39 = vpop.eup %3388  ;;  %1213 = vadd.xlane.f32.xlu0 %v1212_v38  ;;  %v3363_v38 = vld [vmem:[%s4703_s12 + $0x8] sm:$0xff]  }
 0x6c9   : > { %v1215_v40 = vsel %vm988_vm3, %v3389_v39, 0.0 }
 0x6ca   : > { %1216 = vadd.xlane.f32.xlu1 %v1215_v40 }
 0x6db   : > { %1327 = vrot.lane.b32.xlu1 %v4383_v41, %s3872_s14 }
 0x6de   : > { %1375 = vrot.lane.b32.xlu0 %v4387_v44, %s3872_s14 }
 0x6ec   : > { %v1208_v42 = vpop.xlane.xlu0 %1207 }
 0x6ed   : > { %3390 = vrcp.f32 %v1208_v42 }
 0x6f7   : > { %v3391_v43 = vpop.eup %3390 }
 0x6f8   : > { %v1222_v45 = vmul.f32 %v3391_v43, %v3383_v19 }
 0x6fa   : > { %v1226_v46 = vpack.c.bf16 %v1222_v45, %v1222_v45 }
 0x6fc   : > { %3042 = vmatmul.mubr.msk.bf16.vlgmr.msra.gmra.mrb[12].mxu0 %vm988_vm3, %v1226_v46  ;;  %v2864_v46 = vld [vmem:[#allocation10] ss:$0 sm:$0xff] }
 0x6fd   : > { %3053 = vmatprep.mubr.msk.bf16.mxu0 %vm3867_vm0, %v3866_v0 }
 0x74f   : > { %v1211_v47 = vpop.xlane.xlu1 %1210 }
 0x750   : > { %3392 = vrcp.f32 %v1211_v47 }
 0x755   : > { %v1214_v48 = vpop.xlane.xlu0 %1213 }
 0x756   : > { %3394 = vrcp.f32 %v1214_v48  ;;  %v2865_v48 = vld [vmem:[#allocation11] ss:$0 sm:$0xff] }
 0x757   : > { %v1217_v49 = vpop.xlane.xlu1 %1216 }
 0x758   : > { %3396 = vrcp.f32 %v1217_v49 }
 0x759   : > { %v1376_v44 = vpop.permute.xlu0 %1375 }
 0x75a   : > { %v3393_v41 = vpop.eup %3392  ;;  %v1381_v54 = vsel %vm1235_vm4, %v1376_v44, 0  ;;  %v3367_v44 = vld [vmem:[%s4777_s5 + $0x18] sm:$0xff]  }
 0x75b   : > { %v1223_v50 = vmul.f32 %v3393_v41, %v3385_v35  ;;  %v1328_v51 = vpop.permute.xlu1 %1327 }
 0x75c   : > { %v1333_v52 = vsel %vm1235_vm4, %v1328_v51, 0  ;;  %v3366_v51 = vld [vmem:[%s4777_s5 + $0x10] sm:$0xff]  }
 0x75d   : > { %3052 = vmatpush3.bf16.msra.mxu0 %v1333_v52  ;;  %v1227_v53 = vpack.c.bf16 %v1223_v50, %v1223_v50  ;;  %v2866_v52 = vld [vmem:[#allocation13] ss:$0 sm:$0xff] }
 0x75e   : > { %3063 = vmatprep.subr.bf16.mxu0 %v3866_v0 }
 0x75f   : > { %3048 = vmatmul.mubr.msk.bf16.vlgmr.msra.gmra.mrb[12].mxu1 %vm988_vm3, %v1227_v53 }
 0x760   : > { %v3395_v55 = vpop.eup %3394  ;;  %3058 = vmatpush3.bf16.msra.mxu1 %v1381_v54  ;;  %3059 = vmatprep.mubr.msk.bf16.mxu1 %vm3867_vm0, %v3866_v0 }
 0x761   : > { %v1224_v56 = vmul.f32 %v3395_v55, %v3387_v37  ;;  %3071 = vmatprep.subr.bf16.mxu1 %v3866_v0  ;;  %v3362_v37 = vld [vmem:[%s4703_s12] sm:$0xff]  }
 0x762   : > { %v3397_v57 = vpop.eup %3396 }
 0x763   : > { %v1225_v58 = vmul.f32 %v3397_v57, %v3389_v39  ;;  %v1228_v59 = vpack.c.bf16 %v1224_v56, %v1224_v56  ;;  %v3365_v39 = vld [vmem:[%s4777_s5 + $0x8] sm:$0xff]  }
 0x765   : > { %3054 = vmatmul.mubr.msk.bf16.vlgmr.msra.gmra.mrb[16].mxu0 %vm988_vm3, %v1228_v59  ;;  %v1229_v60 = vpack.c.bf16 %v1225_v58, %v1225_v58 }
 0x766   : > { %3067 = vmatprep.mubr.msk.bf16.mxu0 %vm3867_vm0, %v3866_v0  ;;  %3064 = vmatpush3.bf16.msra.mxu0 %v3360_v2 }
 0x767   : > { %3060 = vmatmul.mubr.msk.bf16.vlgmr.msra.gmra.mrb[16].mxu1 %vm988_vm3, %v1229_v60  ;;  %3065 = vmatprep.subr.bf16.mxu0 %v3866_v0  ;;  %v2870_v60 = vld [vmem:[#allocation14] ss:$0 sm:$0xff] }
 0x768   : > { %3075 = vmatprep.mubr.msk.bf16.mxu1 %vm3867_vm0, %v3866_v0  ;;  %3072 = vmatpush3.bf16.msra.mxu1 %v3362_v37 }
 0x769   : > { %3073 = vmatprep.subr.bf16.mxu1 %v3866_v0 }
 0x76a   : > { %3066 = vmatpush3.bf16.msra.mxu0 %v3361_v3 }
 0x76b   : > { %3079 = vmatprep.subr.bf16.mxu0 %v3866_v0 }
 0x76c   : > { %3074 = vmatpush3.bf16.msra.mxu1 %v3363_v38 }
 0x76d   : > { %3091 = vmatprep.subr.bf16.mxu1 %v3866_v0 }
 0x7cf   : > { %v1273_v61 = vpop.f32.mrb[12].mxu0 }
 0x7d0   : > { %v3043_v62 = vpop.f32.mrb[13].mxu0 }
 0x7d1   : > { %v1276_v63 = vpop.f32.mrb[14].mxu0 }
 0x7d2   : > { %v3044_v1 = vpop.f32.mrb[15].mxu0 }
 0x832   : > { %v1321_v4 = vpop.f32.mrb[12].mxu1 }
 0x833   : > { %1424 = vrot.lane.b32.xlu1 %v1321_v4, %s3873_s29  ;;  %v3049_v5 = vpop.f32.mrb[13].mxu1 }
 0x834   : > { %v1324_v6 = vpop.f32.mrb[14].mxu1 }
 0x835   : > { %v3050_v7 = vpop.f32.mrb[15].mxu1 }
 0x838   : > { %v1369_v8 = vpop.f32.mrb[16].mxu0 }
 0x839   : > { %1428 = vrot.lane.b32.xlu0 %v1369_v8, %s3874_s28  ;;  %v3055_v9 = vpop.f32.mrb[17].mxu0 }
 0x83a   : > { %v1372_v10 = vpop.f32.mrb[18].mxu0  ;;  %v1417_v11 = vpop.f32.mrb[16].mxu1 }
 0x83b   : > { %1432 = vrot.lane.b32.xlu1 %v1417_v11, %s3875_s9  ;;  %v3056_v12 = vpop.f32.mrb[19].mxu0  ;;  %v3061_v13 = vpop.f32.mrb[17].mxu1  ;;  %v3368_v10 = vld [vmem:[%s4697_s6 + $0x10] sm:$0xff]   ;;  %v3369_v11 = vld [vmem:[%s4697_s6 + $0x18] sm:$0xff]  }
 0x83c   : > { %v1420_v14 = vpop.f32.mrb[18].mxu1 }
 0x83d   : > { %v3062_v15 = vpop.f32.mrb[19].mxu1 }
 0x8a5   : > { %v1425_v16 = vpop.permute.xlu1 %1424 }
 0x8a6   : > { %v1435_v17 = vsel %vm988_vm3, %v1273_v61, %v1425_v16  ;;  %v2876_v16 = vld [vmem:[#allocation16] ss:$0 sm:$0xff] }
 0x8ab   : > { %v1429_v18 = vpop.permute.xlu0 %1428 }
 0x8ac   : > { %v1436_v19 = vsel %vm812_vm1, %v1435_v17, %v1429_v18  ;;  %v2877_v18 = vld [vmem:[#allocation17] ss:$0 sm:$0xff] }
 0x8ad   : > { %v1433_v20 = vpop.permute.xlu1 %1432 }
 0x8ae   : > { %v1438_v21 = vsel %vm1437_vm5, %v1436_v19, %v1433_v20 }
 0x8af   : > { %v1439_v22 = vpack.c.bf16 %v1438_v21, %v1438_v21 }
 0x8b1   : > { %3068 = vmatmul.mubr.msk.bf16.vlgmr.msra.gmra.mrb[20].mxu0 %vm858_vm2, %v1439_v22  ;;  %v2882_v22 = vld [vmem:[#allocation7 + $0x1] ss:$0 sm:$0xff] }
 0x8b2   : > { %3087 = vmatprep.mubr.msk.bf16.mxu0 %vm3867_vm0, %v3866_v0 }
 0x984   : > { %v1500_v24 = vpop.f32.mrb[20].mxu0 }
 0x985   : > { %v1501_v25 = vadd.f32 %v2860_v23, %v1500_v24  ;;  %v3069_v26 = vpop.f32.mrb[21].mxu0 }
 0x986   : > { %v1503_v27 = vpop.f32.mrb[22].mxu0 }
 0x987   : > { %v3070_v29 = vpop.f32.mrb[23].mxu0  ;;  %v1506_v30 = vadd.f32 %v1501_v25, %v4363_v28  ;;  %v3364_v28 = vld [vmem:[%s4776_s22] sm:$0xff]   ;;  %s787_s22 = sand.u32 1, %s4778_s24  }
 0x988   : > { %3080 = vmatpush3.bf16.msra.mxu0 %v3364_v28  ;;  %s2624_s11 = scalar_lea.sflag [#allocation4], %s787_s22 }
 0x989   : > { %v1509_v31 = vsel %vm858_vm2, %v1506_v30, 0.0  ;;  %3081 = vmatprep.subr.bf16.mxu0 %v3866_v0 }
 0x98a   : > { %1510 = vadd.xlane.f32.xlu0 %v1509_v31 }
 0x98c   : > { %3082 = vmatpush3.bf16.msra.mxu0 %v3365_v39 }
 0x98d   : > { %3083 = vmatprep.subr.bf16.mxu0 %v3866_v0 }
 0x990   : > { %3084 = vmatpush3.bf16.msra.mxu0 %v3366_v51 }
 0x991   : > { %3085 = vmatprep.subr.bf16.mxu0 %v3866_v0 }
 0x994   : > { %3086 = vmatpush3.bf16.msra.mxu0 %v3367_v44 }
 0x995   : > { %3105 = vmatprep.subr.bf16.mxu0 %v3866_v0 }
 0xa17   : > { %v1511_v32 = vpop.xlane.xlu0 %1510 }
 0xa18   : > { %v1512_v33 = vmul.f32 0.03125, %v1511_v32 }
 0xa1a   : > { %v1513_v34 = vsub.f32 %v1506_v30, %v1512_v33 }
 0xa1c   : > { %v1514_v35 = vmul.f32 %v1513_v34, %v1513_v34 }
 0xa1e   : > { %v1515_v36 = vsel %vm858_vm2, %v1514_v35, 0.0 }
 0xa1f   : > { %1516 = vadd.xlane.f32.xlu1 %v1515_v36 }
 0xaac   : > { %v1517_v40 = vpop.xlane.xlu1 %1516 }
 0xaad   : > { %v1518_v42 = vmul.f32 0.03125, %v1517_v40 }
 0xaaf   : > { %v1519_v43 = vadd.f32 1e-05, %v1518_v42 }
 0xab1   : > { %3398 = vrsqrt.f32 %v1519_v43 }
 0xabb   : > { %v3399_v45 = vpop.eup %3398 }
 0xabc   : > { %v1521_v47 = vmul.f32 %v3399_v45, %v1513_v34 }
 0xabe   : > { %v1528_v49 = vmul.f32 %v2864_v46, %v1521_v47 }
 0xac0   : > { %v1535_v41 = vadd.f32 %v2865_v48, %v1528_v49 }
 0xac2   : > { %v1536_v50 = vpack.c.bf16 %v1535_v41, %v1535_v41 }
 0xac4   : > { %3076 = vmatmul.mubr.msk.bf16.vlgmr.msra.gmra.mrb[20].mxu1 %vm858_vm2, %v1536_v50 }
 0xac5   : > { %3095 = vmatprep.mubr.msk.bf16.mxu1 %vm3867_vm0, %v3866_v0  ;;  %3092 = vmatpush3.bf16.msra.mxu1 %v3368_v10 }
 0xac6   : > { %3093 = vmatprep.subr.bf16.mxu1 %v3866_v0 }
 0xac9   : > { %3094 = vmatpush3.bf16.msra.mxu1 %v3369_v11 }
 0xaca   : > { %3099 = vmatprep.subr.bf16.mxu1 %v3866_v0 }
 0xb97   : > { %v1597_v53 = vpop.f32.mrb[20].mxu1 }
 0xb98   : > { %v1598_v54 = vadd.f32 %v2866_v52, %v1597_v53  ;;  %v3077_v55 = vpop.f32.mrb[21].mxu1 }
 0xb99   : > { %v1600_v56 = vpop.f32.mrb[22].mxu1 }
 0xb9a   : > { %v1603_v57 = vmax.f32 %v1598_v54, 0.0  ;;  %v3078_v58 = vpop.f32.mrb[23].mxu1 }
 0xb9c   : > { %v1604_v59 = vpack.c.bf16 %v1603_v57, %v1603_v57 }
 0xb9e   : > { %3088 = vmatmul.mubr.msk.bf16.vlgmr.msra.gmra.mrb[24].mxu0 %vm1644_vm6, %v1604_v59 }
 0xb9f   : > { %3107 = vmatprep.mubr.msk.bf16.mxu0 %vm3867_vm0, %v3866_v0 }
 0xc71   : > { %v1682_v61 = vpop.f32.mrb[24].mxu0 }
 0xc72   : > { %v1683_v62 = vadd.f32 %v2870_v60, %v1682_v61  ;;  %v3089_v63 = vpop.f32.mrb[25].mxu0 }
 0xc73   : > { %v1685_v1 = vpop.f32.mrb[26].mxu0 }
 0xc74   : > { %v3090_v2 = vpop.f32.mrb[27].mxu0  ;;  %v1688_v3 = vadd.f32 %v1683_v62, %v1535_v41 }
 0xc76   : > { %v1691_v4 = vsel %vm858_vm2, %v1688_v3, 0.0 }
 0xc77   : > { %1692 = vadd.xlane.f32.xlu0 %v1691_v4 }
 0xd04   : > { %v1693_v5 = vpop.xlane.xlu0 %1692 }
 0xd05   : > { %v1694_v6 = vmul.f32 0.03125, %v1693_v5 }
 0xd07   : > { %v1695_v7 = vsub.f32 %v1688_v3, %v1694_v6 }
 0xd09   : > { %v1696_v8 = vmul.f32 %v1695_v7, %v1695_v7 }
 0xd0b   : > { %v1697_v9 = vsel %vm858_vm2, %v1696_v8, 0.0 }
 0xd0c   : > { %1698 = vadd.xlane.f32.xlu0 %v1697_v9 }
 0xd99   : > { %v1699_v12 = vpop.xlane.xlu0 %1698 }
 0xd9a   : > { %v1700_v13 = vmul.f32 0.03125, %v1699_v12 }
 0xd9c   : > { %v1701_v14 = vadd.f32 1e-05, %v1700_v13 }
 0xd9e   : > { %3400 = vrsqrt.f32 %v1701_v14 }
 0xda8   : > { %v3401_v15 = vpop.eup %3400 }
 0xda9   : > { %v1703_v17 = vmul.f32 %v3401_v15, %v1695_v7 }
 0xdab   : > { %v1710_v19 = vmul.f32 %v2876_v16, %v1703_v17 }
 0xdad   : > { %v4508_v20 = vadd.f32 %v2877_v18, %v1710_v19 }
 0xdaf   : > { %v1718_v21 = vpack.c.bf16 %v4508_v20, %v4508_v20 }
 0xdb1   : > { %3096 = vmatmul.mubr.msk.bf16.vlgmr.msra.gmra.mrb[24].mxu1 %vm858_vm2, %v1718_v21 }
 0xdb2   : > { %3101 = vmatprep.mubr.msk.bf16.mxu1 %vm3867_vm0, %v3866_v0 }
 0xe84   : > { %v1781_v23 = vpop.f32.mrb[24].mxu1 }
 0xe85   : > { %v1782_v24 = vadd.f32 %v2882_v22, %v1781_v23  ;;  %v3097_v25 = vpop.f32.mrb[25].mxu1 }
 0xe86   : > { %v1784_v26 = vpop.f32.mrb[26].mxu1 }
 0xe87   : > { %1806 = vrot.lane.b32.xlu0 %v1782_v24, %s3870_s25  ;;  %1803 = vrot.lane.b32.xlu1 %v1782_v24, %s3869_s30  ;;  %v3098_v27 = vpop.f32.mrb[27].mxu1  ;;  %v4518_v29 = vpack.c.bf16 %v1782_v24, %v1782_v24  ;;  %v1787_v30 = vmul.f32 0.35355338, %v1782_v24 }
 0xe89   : > { %v1798_v28 = vpack.c.bf16 %v1787_v30, %v1787_v30 }
 0xe8b   : > { %1809 = vrot.lane.b32.xlu1 %v1782_v24, %s3868_s20 }
 0xe8f   : > { %1817 = vrot.lane.b32.xlu1 %v4518_v29, %s3871_s4 }
 0xe93   : > { %1789 = vrot.lane.b32.xlu1 %v1787_v30, %s3869_s30  ;;  %s4779_s30 = sld [smem:[#allocation37_spill]] }
 0xe99   : > { %p4781_p6 = scmp.ne.s32.totalorder %s4779_s30, 0 }
 0xef9   : > { %v1804_v31 = vpop.permute.xlu1 %1803  ;;  %v1807_v33 = vpop.permute.xlu0 %1806 }
 0xefa   : > { %v4523_v32 = vpack.c.bf16 %v1804_v31, %v1804_v31  ;;  %v4527_v35 = vpack.c.bf16 %v1807_v33, %v1807_v33 }
 0xefc   : > { %1866 = vrot.lane.b32.xlu0 %v4523_v32, %s3871_s4 }
 0xefd   : > { %v1810_v34 = vpop.permute.xlu1 %1809 }
 0xefe   : > { %v4529_v36 = vpack.c.bf16 %v1810_v34, %v1810_v34 }
 0xf00   : > { %1915 = vrot.lane.b32.xlu0 %v4527_v35, %s3871_s4  ;;  %1964 = vrot.lane.b32.xlu1 %v4529_v36, %s3871_s4 }
 0xf01   : > { %v1818_v37 = vpop.permute.xlu1 %1817 }
 0xf02   : > { %v1823_v38 = vsel %vm988_vm3, %v1818_v37, 0 }
 0xf03   : > { %3100 = vmatpush3.bf16.xpose.msra.mxu1 %v1823_v38 }
 0xf04   : > { %1792 = vrot.lane.b32.xlu0 %v1787_v30, %s3870_s25  ;;  %1795 = vrot.lane.b32.xlu1 %v1787_v30, %s3868_s20  ;;  %s2841_s20 = sshll.u32 %s787_s22, 3  ;;  %s2933_s25 = sshll.u32 %s4003_s2, 7 }
 0xf05   : > { %3111 = vmatprep.subr.bf16.mxu1 %v3866_v0  ;;  %v1790_v42 = vpop.permute.xlu1 %1789  ;;  %s789_s4 = scalar_lea.vmem [#allocation22], %s2841_s20 }
 0xf06   : > { %v1799_v47 = vpack.c.bf16 %v1790_v42, %v1790_v42 }
 0xf0a   : > { %3102 = vmatmul.mubr.msk.bf16.vlgmr.msra.gmra.mrb[28].mxu1 %vm988_vm3, %v1798_v28 }
 0xf0b   : > { %3113 = vmatprep.mubr.msk.bf16.mxu1 %vm3867_vm0, %v3866_v0 }
 0xf6e   : > { %v1867_v39 = vpop.permute.xlu0 %1866 }
 0xf6f   : > { %v1872_v40 = vsel %vm988_vm3, %v1867_v39, 0 }
 0xf70   : > { %3106 = vmatpush3.bf16.xpose.msra.mxu0 %v1872_v40 }
 0xf71   : > { %3117 = vmatprep.subr.bf16.mxu0 %v3866_v0 }
 0xf72   : > { %v1916_v43 = vpop.permute.xlu0 %1915  ;;  %v1965_v46 = vpop.permute.xlu1 %1964 }
 0xf73   : > { %v1921_v45 = vsel %vm988_vm3, %v1916_v43, 0  ;;  %v1970_v49 = vsel %vm988_vm3, %v1965_v46, 0 }
 0xf74   : > { %3112 = vmatpush3.bf16.xpose.msra.mxu1 %v1921_v45 }
 0xf75   : > { %3123 = vmatprep.subr.bf16.mxu1 %v3866_v0 }
 0xf76   : > { %v1793_v48 = vpop.permute.xlu0 %1792  ;;  %v1796_v50 = vpop.permute.xlu1 %1795 }
 0xf77   : > { %3108 = vmatmul.mubr.msk.bf16.vlgmr.msra.gmra.mrb[28].mxu0 %vm988_vm3, %v1799_v47  ;;  %v1800_v41 = vpack.c.bf16 %v1793_v48, %v1793_v48  ;;  %v1801_v51 = vpack.c.bf16 %v1796_v50, %v1796_v50 }
 0xf78   : > { %3118 = vmatpush3.bf16.xpose.msra.mxu0 %v1970_v49  ;;  %3119 = vmatprep.mubr.msk.bf16.mxu0 %vm3867_vm0, %v3866_v0 }
 0xf79   : > { %3129 = vmatprep.subr.bf16.mxu0 %v3866_v0 }
 0xf7b   : > { %3114 = vmatmul.mubr.msk.bf16.vlgmr.msra.gmra.mrb[32].mxu1 %vm988_vm3, %v1800_v41 }
 0xf7c   : > { %3125 = vmatprep.mubr.msk.bf16.mxu1 %vm3867_vm0, %v3866_v0 }
 0xf7f   : > { %3120 = vmatmul.mubr.msk.bf16.vlgmr.msra.gmra.mrb[32].mxu0 %vm988_vm3, %v1801_v51 }
 0xf80   : > { %3131 = vmatprep.mubr.msk.bf16.mxu0 %vm3867_vm0, %v3866_v0 }
 0xfdd   : > { %v1859_v44 = vpop.f32.mrb[28].mxu1 }
 0xfde   : > { %v3103_v52 = vpop.f32.mrb[29].mxu1  ;;  %v2012_v53 = vsel %vm988_vm3, %v1859_v44, -inf }
 0xfdf   : > { %2013 = vmax.xlane.f32.xlu0 %v2012_v53  ;;  %v1862_v54 = vpop.f32.mrb[30].mxu1 }
 0xfe0   : > { %v3104_v55 = vpop.f32.mrb[31].mxu1 }
0x104a   : > { %v1908_v56 = vpop.f32.mrb[28].mxu0 }
0x104b   : > { %v3109_v57 = vpop.f32.mrb[29].mxu0  ;;  %v2015_v58 = vsel %vm988_vm3, %v1908_v56, -inf }
0x104c   : > { %2016 = vmax.xlane.f32.xlu1 %v2015_v58  ;;  %v1911_v59 = vpop.f32.mrb[30].mxu0  ;;  %v3370_v57 = vld [vmem:[%s4699_s8 + $0x10] sm:$0xff]   ;;  %v3371_v58 = vld [vmem:[%s4699_s8 + $0x18] sm:$0xff]  }
0x104d   : > { %v3110_v60 = vpop.f32.mrb[31].mxu0 }
0x104e   : > { %v1957_v61 = vpop.f32.mrb[32].mxu1 }
0x104f   : > { %v3115_v62 = vpop.f32.mrb[33].mxu1  ;;  %v2018_v63 = vsel %vm988_vm3, %v1957_v61, -inf }
0x1050   : > { %2019 = vmax.xlane.f32.xlu0 %v2018_v63  ;;  %v1960_v1 = vpop.f32.mrb[34].mxu1 }
0x1051   : > { %v3116_v2 = vpop.f32.mrb[35].mxu1 }
0x1052   : > { %v2006_v3 = vpop.f32.mrb[32].mxu0 }
0x1053   : > { %v3121_v4 = vpop.f32.mrb[33].mxu0  ;;  %v2021_v5 = vsel %vm988_vm3, %v2006_v3, -inf }
0x1054   : > { %2022 = vmax.xlane.f32.xlu0 %v2021_v5  ;;  %v2009_v6 = vpop.f32.mrb[34].mxu0 }
0x1055   : > { %v3122_v7 = vpop.f32.mrb[35].mxu0 }
0x105d   : > { %2060 = vrot.lane.b32.xlu1 %v4518_v29, %s3872_s14 }
0x106c   : > { %v2014_v8 = vpop.xlane.xlu0 %2013 }
0x106d   : > { %v2024_v9 = vsub.f32 %v1859_v44, %v2014_v8 }
0x106f   : > { %v2028_v10 = vmul.f32 1.442695, %v2024_v9 }
0x1071   : > { %3402 = vpow2.f32 %v2028_v10 }
0x107b   : > { %v3403_v11 = vpop.eup %3402 }
0x107c   : > { %v2036_v12 = vsel %vm988_vm3, %v3403_v11, 0.0 }
0x1081   : > { %2037 = vadd.xlane.f32.xlu1 %v2036_v12 }
0x10d9   : > { %v2017_v13 = vpop.xlane.xlu1 %2016 }
0x10da   : > { %v2025_v14 = vsub.f32 %v1908_v56, %v2017_v13 }
0x10dc   : > { %v2030_v15 = vmul.f32 1.442695, %v2025_v14 }
0x10dd   : > { %v2020_v16 = vpop.xlane.xlu0 %2019  ;;  %v2061_v17 = vpop.permute.xlu1 %2060 }
0x10de   : > { %3404 = vpow2.f32 %v2030_v15  ;;  %v2026_v18 = vsub.f32 %v1957_v61, %v2020_v16  ;;  %v2066_v19 = vsel %vm1235_vm4, %v2061_v17, 0  ;;  %v2898_v15 = vld [vmem:[#allocation8 + $0x1] ss:$0 sm:$0xff] }
0x10df   : > { %3124 = vmatpush3.bf16.msra.mxu1 %v2066_v19 }
0x10e0   : > { %v2032_v21 = vmul.f32 1.442695, %v2026_v18  ;;  %3135 = vmatprep.subr.bf16.mxu1 %v3866_v0 }
0x10e1   : > { %v2023_v22 = vpop.xlane.xlu0 %2022 }
0x10e2   : > { %3406 = vpow2.f32 %v2032_v21  ;;  %v2027_v23 = vsub.f32 %v2006_v3, %v2023_v22 }
0x10e4   : > { %v2034_v24 = vmul.f32 1.442695, %v2027_v23 }
0x10e6   : > { %3408 = vpow2.f32 %v2034_v24 }
0x10e8   : > { %v3405_v25 = vpop.eup %3404 }
0x10e9   : > { %v2039_v26 = vsel %vm988_vm3, %v3405_v25, 0.0 }
0x10ea   : > { %2040 = vadd.xlane.f32.xlu0 %v2039_v26 }
0x10ec   : > { %v3407_v27 = vpop.eup %3406 }
0x10ed   : > { %v2042_v29 = vsel %vm988_vm3, %v3407_v27, 0.0 }
0x10ee   : > { %2043 = vadd.xlane.f32.xlu1 %v2042_v29 }
0x10f0   : > { %v3409_v30 = vpop.eup %3408 }
0x10f1   : > { %v2045_v31 = vsel %vm988_vm3, %v3409_v30, 0.0 }
0x10f2   : > { %2046 = vadd.xlane.f32.xlu0 %v2045_v31  ;;  %v3373_v31 = vld [vmem:[%s4703_s12 + $0x18] sm:$0xff]  }
0x10ff   : > { %2156 = vrot.lane.b32.xlu1 %v4527_v35, %s3872_s14 }
0x1103   : > { %2204 = vrot.lane.b32.xlu1 %v4529_v36, %s3872_s14 }
0x1108   : > { %2108 = vrot.lane.b32.xlu0 %v4523_v32, %s3872_s14  ;;  %s2637_s14 = sshll.u32 %s789_s4, 4  ;;  %s4651_s14 = int_to_ptr.vmem [resolvable:$true] %s2637_s14 }
0x1109   : > { %s3758_s2 = scalar_lea.vmem %s4651_s14, 128  ;;  %p3765_p12 = scmp.lt.s32.totalorder %s4651_s14, %s3763_s27 }
0x110a   : > { %p3759_p0 = scmp.ne.s32.totalorder %s4651_s14, %s3758_s2  ;;  %p3766_p10 = scmp.lt.s32.totalorder %s3764_s26, %s3758_s2 }
0x110c   : > { %p3760_p5 = pnand %p3759_p0, %p4781_p6  ;;  %p3767_p2 = por %p3766_p10, %p3765_p12 }
0x110e   : > { %v2038_v33 = vpop.xlane.xlu1 %2037  ;;  %p3761_p9 = pneg %p3760_p5 }
0x110f   : > { %3410 = vrcp.f32 %v2038_v33  ;;  %v3375_v33 = vld [vmem:[%s4777_s5 + $0x28] sm:$0xff]  }
0x1110   : > { %p3768_p3 = pnand %p3767_p2, %p3761_p9 }
0x1119   : > { %v3411_v34 = vpop.eup %3410 }
0x111a   : > { %v2052_v37 = vmul.f32 %v3411_v34, %v3403_v11 }
0x111c   : > { %v2056_v38 = vpack.c.bf16 %v2052_v37, %v2052_v37 }
0x111e   : > { %3126 = vmatmul.mubr.msk.bf16.vlgmr.msra.gmra.mrb[36].mxu1 %vm988_vm3, %v2056_v38 }
0x111f   : > { %3137 = vmatprep.mubr.msk.bf16.mxu1 %vm3867_vm0, %v3866_v0 }
0x1177   : > { %v2041_v28 = vpop.xlane.xlu0 %2040 }
0x1178   : > { %3412 = vrcp.f32 %v2041_v28 }
0x117b   : > { %v2044_v39 = vpop.xlane.xlu1 %2043 }
0x117c   : > { %3414 = vrcp.f32 %v2044_v39  ;;  %v2902_v39 = vld [vmem:[#allocation10 + $0x1] ss:$0 sm:$0xff] }
0x117f   : > { %v2157_v35 = vpop.permute.xlu1 %2156  ;;  %v2047_v40 = vpop.xlane.xlu0 %2046 }
0x1180   : > { %v2162_v36 = vsel %vm1235_vm4, %v2157_v35, 0  ;;  %3416 = vrcp.f32 %v2047_v40  ;;  %v2903_v40 = vld [vmem:[#allocation11 + $0x1] ss:$0 sm:$0xff] }
0x1181   : > { %3136 = vmatpush3.bf16.msra.mxu1 %v2162_v36 }
0x1182   : > { %v3413_v32 = vpop.eup %3412  ;;  %3147 = vmatprep.subr.bf16.mxu1 %v3866_v0 }
0x1183   : > { %v2053_v42 = vmul.f32 %v3413_v32, %v3405_v25  ;;  %v2109_v43 = vpop.permute.xlu0 %2108  ;;  %v2205_v46 = vpop.permute.xlu1 %2204 }
0x1184   : > { %v2114_v45 = vsel %vm1235_vm4, %v2109_v43, 0  ;;  %v2210_v41 = vsel %vm1235_vm4, %v2205_v46, 0  ;;  %v3376_v43 = vld [vmem:[%s4777_s5 + $0x30] sm:$0xff]   ;;  %v2908_v46 = vld [vmem:[#allocation13 + $0x1] ss:$0 sm:$0xff] }
0x1185   : > { %3130 = vmatpush3.bf16.msra.mxu0 %v2114_v45  ;;  %v2057_v47 = vpack.c.bf16 %v2053_v42, %v2053_v42  ;;  %v3377_v45 = vld [vmem:[%s4777_s5 + $0x38] sm:$0xff]  }
0x1186   : > { %v3415_v48 = vpop.eup %3414  ;;  %3141 = vmatprep.subr.bf16.mxu0 %v3866_v0 }
0x1187   : > { %v2054_v49 = vmul.f32 %v3415_v48, %v3407_v27 }
0x1188   : > { %3132 = vmatmul.mubr.msk.bf16.vlgmr.msra.gmra.mrb[36].mxu0 %vm988_vm3, %v2057_v47 }
0x1189   : > { %3142 = vmatpush3.bf16.msra.mxu0 %v2210_v41  ;;  %v2058_v50 = vpack.c.bf16 %v2054_v49, %v2054_v49  ;;  %3143 = vmatprep.mubr.msk.bf16.mxu0 %vm3867_vm0, %v3866_v0 }
0x118a   : > { %v3417_v51 = vpop.eup %3416  ;;  %3155 = vmatprep.subr.bf16.mxu0 %v3866_v0 }
0x118b   : > { %v2055_v44 = vmul.f32 %v3417_v51, %v3409_v30  ;;  %3138 = vmatmul.mubr.msk.bf16.vlgmr.msra.gmra.mrb[40].mxu1 %vm988_vm3, %v2058_v50  ;;  %v3372_v30 = vld [vmem:[%s4703_s12 + $0x10] sm:$0xff]  }
0x118c   : > { %3151 = vmatprep.mubr.msk.bf16.mxu1 %vm3867_vm0, %v3866_v0  ;;  %3148 = vmatpush3.bf16.msra.mxu1 %v3370_v57 }
0x118d   : > { %v2059_v52 = vpack.c.bf16 %v2055_v44, %v2055_v44  ;;  %3149 = vmatprep.subr.bf16.mxu1 %v3866_v0 }
0x1190   : > { %3144 = vmatmul.mubr.msk.bf16.vlgmr.msra.gmra.mrb[40].mxu0 %vm988_vm3, %v2059_v52  ;;  %3150 = vmatpush3.bf16.msra.mxu1 %v3371_v58  ;;  %v2920_v52 = vld [vmem:[#allocation14 + $0x1] ss:$0 sm:$0xff] }
0x1191   : > { %3159 = vmatprep.mubr.msk.bf16.mxu0 %vm3867_vm0, %v3866_v0  ;;  %3163 = vmatprep.subr.bf16.mxu1 %v3866_v0 }
0x1192   : > { %3156 = vmatpush3.bf16.msra.mxu0 %v3372_v30 }
0x1193   : > { %3157 = vmatprep.subr.bf16.mxu0 %v3866_v0 }
0x1196   : > { %3158 = vmatpush3.bf16.msra.mxu0 %v3373_v31 }
0x1197   : > { %3175 = vmatprep.subr.bf16.mxu0 %v3866_v0 }
0x11f1   : > { %v2102_v53 = vpop.f32.mrb[36].mxu1 }
0x11f2   : > { %v3127_v54 = vpop.f32.mrb[37].mxu1 }
0x11f3   : > { %v2105_v55 = vpop.f32.mrb[38].mxu1 }
0x11f4   : > { %v3128_v56 = vpop.f32.mrb[39].mxu1 }
0x125b   : > { %v2150_v59 = vpop.f32.mrb[36].mxu0 }
0x125c   : > { %2253 = vrot.lane.b32.xlu0 %v2150_v59, %s3873_s29  ;;  %v3133_v60 = vpop.f32.mrb[37].mxu0 }
0x125d   : > { %v2153_v61 = vpop.f32.mrb[38].mxu0 }
0x125e   : > { %v3134_v62 = vpop.f32.mrb[39].mxu0  ;;  %v2198_v63 = vpop.f32.mrb[40].mxu1 }
0x125f   : > { %2257 = vrot.lane.b32.xlu1 %v2198_v63, %s3874_s28  ;;  %v3139_v1 = vpop.f32.mrb[41].mxu1 }
0x1260   : > { %v2201_v2 = vpop.f32.mrb[42].mxu1 }
0x1261   : > { %v3140_v3 = vpop.f32.mrb[43].mxu1  ;;  %v3378_v2 = vld [vmem:[#allocation19] sm:$0xff]  }
0x1262   : > { %v3379_v3 = vld [vmem:[#allocation19 + $0x8] sm:$0xff]  }
0x1263   : > { %v2246_v4 = vpop.f32.mrb[40].mxu0 }
0x1264   : > { %2261 = vrot.lane.b32.xlu0 %v2246_v4, %s3875_s9  ;;  %v3145_v5 = vpop.f32.mrb[41].mxu0  ;;  %s4780_s9 = sld [smem:[#allocation49_spill]] }
0x1265   : > { %v2249_v6 = vpop.f32.mrb[42].mxu0 }
0x1266   : > { %v3146_v7 = vpop.f32.mrb[43].mxu0 }
0x126a   : > { %s4649_s15 = scalar_lea.hbm %s4780_s9, %s2933_s25 }
0x12ce   : > { %v2254_v8 = vpop.permute.xlu0 %2253 }
0x12cf   : > { %v2264_v10 = vsel %vm988_vm3, %v2102_v53, %v2254_v8  ;;  %v2926_v8 = vld [vmem:[#allocation16 + $0x1] ss:$0 sm:$0xff] }
0x12d1   : > { %v2258_v9 = vpop.permute.xlu1 %2257 }
0x12d2   : > { %v2265_v11 = vsel %vm812_vm1, %v2264_v10, %v2258_v9  ;;  %v2927_v10 = vld [vmem:[#allocation17 + $0x1] ss:$0 sm:$0xff] }
0x12d6   : > { %v2262_v12 = vpop.permute.xlu0 %2261 }
0x12d7   : > { %v2266_v13 = vsel %vm1437_vm5, %v2265_v11, %v2262_v12 }
0x12d8   : > { %v2267_v14 = vpack.c.bf16 %v2266_v13, %v2266_v13 }
0x12da   : > { %3152 = vmatmul.mubr.msk.bf16.vlgmr.msra.gmra.mrb[44].mxu1 %vm858_vm2, %v2267_v14  ;;  %v2928_v14 = vld [vmem:[#allocation20] ss:$0 sm:$0xff] }
0x12db   : > { %3171 = vmatprep.mubr.msk.bf16.mxu1 %vm3867_vm0, %v3866_v0 }
0x13ad   : > { %v2330_v16 = vpop.f32.mrb[44].mxu1 }
0x13ae   : > { %v2331_v17 = vadd.f32 %v2898_v15, %v2330_v16  ;;  %v3153_v18 = vpop.f32.mrb[45].mxu1 }
0x13af   : > { %v2333_v19 = vpop.f32.mrb[46].mxu1 }
0x13b0   : > { %v3154_v21 = vpop.f32.mrb[47].mxu1  ;;  %v2336_v22 = vadd.f32 %v2331_v17, %v4508_v20  ;;  %v3374_v20 = vld [vmem:[%s4777_s5 + $0x20] sm:$0xff]  }
0x13b1   : > { %3164 = vmatpush3.bf16.msra.mxu1 %v3374_v20 }
0x13b2   : > { %v2341_v23 = vsel %vm858_vm2, %v2336_v22, 0.0  ;;  %3165 = vmatprep.subr.bf16.mxu1 %v3866_v0 }
0x13b3   : > { %2342 = vadd.xlane.f32.xlu1 %v2341_v23 }
0x13b5   : > { %3166 = vmatpush3.bf16.msra.mxu1 %v3375_v33 }
0x13b6   : > { %3167 = vmatprep.subr.bf16.mxu1 %v3866_v0 }
0x13b9   : > { %3168 = vmatpush3.bf16.msra.mxu1 %v3376_v43 }
0x13ba   : > { %3169 = vmatprep.subr.bf16.mxu1 %v3866_v0 }
0x13bd   : > { %3170 = vmatpush3.bf16.msra.mxu1 %v3377_v45 }
0x1440   : > { %v2343_v24 = vpop.xlane.xlu1 %2342 }
0x1441   : > { %v2344_v25 = vmul.f32 0.03125, %v2343_v24 }
0x1443   : > { %v2345_v26 = vsub.f32 %v2336_v22, %v2344_v25 }
0x1445   : > { %v2346_v27 = vmul.f32 %v2345_v26, %v2345_v26 }
0x1447   : > { %v2347_v29 = vsel %vm858_vm2, %v2346_v27, 0.0 }
0x1448   : > { %2348 = vadd.xlane.f32.xlu0 %v2347_v29 }
0x14d5   : > { %v2349_v34 = vpop.xlane.xlu0 %2348 }
0x14d6   : > { %v2350_v37 = vmul.f32 0.03125, %v2349_v34 }
0x14d8   : > { %v2351_v38 = vadd.f32 1e-05, %v2350_v37 }
0x14da   : > { %3418 = vrsqrt.f32 %v2351_v38 }
0x14e4   : > { %v3419_v28 = vpop.eup %3418 }
0x14e5   : > { %v2353_v35 = vmul.f32 %v3419_v28, %v2345_v26 }
0x14e7   : > { %v2360_v36 = vmul.f32 %v2902_v39, %v2353_v35 }
0x14e9   : > { %v2367_v32 = vadd.f32 %v2903_v40, %v2360_v36 }
0x14eb   : > { %v2368_v42 = vpack.c.bf16 %v2367_v32, %v2367_v32 }
0x14ed   : > { %3160 = vmatmul.mubr.msk.bf16.vlgmr.msra.gmra.mrb[44].mxu0 %vm858_vm2, %v2368_v42 }
0x14ee   : > { %3179 = vmatprep.mubr.msk.bf16.mxu0 %vm3867_vm0, %v3866_v0  ;;  %3176 = vmatpush3.bf16.msra.mxu0 %v3378_v2 }
0x14ef   : > { %3177 = vmatprep.subr.bf16.mxu0 %v3866_v0 }
0x14f2   : > { %3178 = vmatpush3.bf16.msra.mxu0 %v3379_v3 }
0x15c0   : > { %v2431_v47 = vpop.f32.mrb[44].mxu0 }
0x15c1   : > { %v2432_v48 = vadd.f32 %v2908_v46, %v2431_v47  ;;  %v3161_v49 = vpop.f32.mrb[45].mxu0 }
0x15c2   : > { %v2434_v41 = vpop.f32.mrb[46].mxu0 }
0x15c3   : > { %v2437_v50 = vmax.f32 %v2432_v48, 0.0  ;;  %v3162_v51 = vpop.f32.mrb[47].mxu0 }
0x15c5   : > { %v2438_v44 = vpack.c.bf16 %v2437_v50, %v2437_v50 }
0x15c7   : > { %3172 = vmatmul.mubr.msk.bf16.vlgmr.msra.gmra.mrb[48].mxu1 %vm1644_vm6, %v2438_v44 }
0x169a   : > { %v2517_v53 = vpop.f32.mrb[48].mxu1 }
0x169b   : > { %v2518_v54 = vadd.f32 %v2920_v52, %v2517_v53  ;;  %v3173_v55 = vpop.f32.mrb[49].mxu1 }
0x169c   : > { %v2520_v56 = vpop.f32.mrb[50].mxu1 }
0x169d   : > { %v3174_v57 = vpop.f32.mrb[51].mxu1  ;;  %v2523_v58 = vadd.f32 %v2518_v54, %v2367_v32 }
0x169f   : > { %v2528_v59 = vsel %vm858_vm2, %v2523_v58, 0.0 }
0x16a0   : > { %2529 = vadd.xlane.f32.xlu0 %v2528_v59 }
0x172d   : > { %v2530_v60 = vpop.xlane.xlu0 %2529 }
0x172e   : > { %v2531_v61 = vmul.f32 0.03125, %v2530_v60 }
0x1730   : > { %v2532_v62 = vsub.f32 %v2523_v58, %v2531_v61 }
0x1732   : > { %v2533_v63 = vmul.f32 %v2532_v62, %v2532_v62 }
0x1734   : > { %v2534_v1 = vsel %vm858_vm2, %v2533_v63, 0.0 }
0x1735   : > { %2535 = vadd.xlane.f32.xlu1 %v2534_v1 }
0x17c2   : > { %v2536_v4 = vpop.xlane.xlu1 %2535 }
0x17c3   : > { %v2537_v5 = vmul.f32 0.03125, %v2536_v4 }
0x17c5   : > { %v2538_v6 = vadd.f32 1e-05, %v2537_v5 }
0x17c7   : > { %3420 = vrsqrt.f32 %v2538_v6 }
0x17d1   : > { %v3421_v7 = vpop.eup %3420 }
0x17d2   : > { %v2540_v9 = vmul.f32 %v3421_v7, %v2532_v62 }
0x17d4   : > { %v2547_v11 = vmul.f32 %v2926_v8, %v2540_v9 }
0x17d6   : > { %v2554_v12 = vadd.f32 %v2927_v10, %v2547_v11 }
0x17d8   : > { %v2555_v13 = vpack.c.bf16 %v2554_v12, %v2554_v12 }
0x17da   : > { %3180 = vmatmul.mubr.msk.bf16.vlgmr.msra.gmra.mrb[48].mxu0 %vm858_vm2, %v2555_v13 }
0x18ad   : > { %v2616_v0 = vpop.f32.mrb[48].mxu0 }
0x18ae   : > { %v2617_v15 = vadd.f32 %v2928_v14, %v2616_v0  ;;  %v3181_v16 = vpop.f32.mrb[49].mxu0 }
0x18af   : > { %v2619_v17 = vpop.f32.mrb[50].mxu0 }
0x18b0   : > { %2622 = vst [vmem:[%s789_s4] sm:$0xff] %v2617_v15  ;;  %v3182_v18 = vpop.f32.mrb[51].mxu0 }
0x18b1   : > { %3771 = shalt.err (!%p3768_p3)
}
0x18b2   : > { %s3772_s3 = scalar_lea.hbm %s4649_s15, 128  ;;  %s3776_s24 = scalar_lea.hbm %s4780_s9, 256 }
0x18b3   : > { %p3773_p4 = scmp.ne.s32.totalorder %s4649_s15, %s3772_s3  ;;  %p3777_p11 = scmp.lt.u32.totalorder %s4649_s15, %s4780_s9 }
0x18b4   : > { %p3778_p13 = scmp.lt.u32.totalorder %s3776_s24, %s3772_s3  ;;  %p3780_p0 = scmp.lt.u32.totalorder %s3772_s3, %s4649_s15 }
0x18b5   : > { %p3774_p7 = pnand %p3773_p4, %p4781_p6 }
0x18b6   : > { %p3779_p1 = por %p3778_p13, %p3777_p11 }
0x18b7   : > { %p3775_p8 = pneg %p3774_p7 }
0x18b8   : > { %p3781_p5 = por %p3780_p0, %p3779_p1 }
0x18ba   : > { %p3782_p9 = pnand %p3781_p5, %p3775_p8 }
0x18bc   : > { %3785 = shalt.err (!%p3782_p9)
}
0x18bd   : > { %3231 = dma.vmem_to_hbm [thread:$0]  (%p4781_p6), %s4651_s14, 128, %s4649_s15, %s2624_s11  }
0x18be PF: > { %s4782_s25 = sld [smem:[#allocation34_spill]]  ;;  %s4783_s4 = sld [smem:[#allocation31_spill]] }
0x18bf   : > { %s4784_s29 = sld [smem:[#allocation38_spill]] }
0x18c4   : > { %p3298_p12 = scmp.ge.s32.totalorder %s4782_s25, 2  ;;  %s2649_s28 = sand.u32 1, %s4783_s4  }
0x18c5   : > { %p4785_p10 = scmp.ne.s32.totalorder %s4784_s29, 0  ;;  %s2650_s2 = scalar_lea.sflag [#allocation4], %s2649_s28 }
0x18c7   : > { %p3271_p2 = pnand %p3298_p12, %p4785_p10 }
0x18c9   : > { %3831 = dma.done.wait (!%p3271_p2), %s2650_s2, 128  }
0x18ca   : > { %3833 = vsyncadd (!%p3271_p2), %s2650_s2, 4294967168  ;;  %s4786_s24 = sld [smem:[#allocation35_spill]]  ;;  %s4787_s1 = sld [smem:[#allocation32_spill]] }
0x18cb   : > { %s4788_s22 = sld [smem:[#allocation33_spill]]  ;;  %s4789_s23 = sld [smem:[#allocation36_spill]] }
0x18d0   : > { %p37_p3 = scmp.ge.s32.totalorder %s4786_s24, 4  }
0x18d2   :  { %39 = sbr.rel (!%p37_p3) target bundleno = 22 (0x16), region = 196 }
0x18d9   :  { %2655 = vsyncpa [#allocation3], 1 }
0x18da   :  { %2657 = vsyncpa [#allocation3 + $0x1], 1 }
0x18db   :  { %2658 = vsyncpa [#allocation6], 1 }
0x18dc   :  { %2659 = vsyncpa [#allocation9], 1 }
0x18dd   :  { %2660 = vsyncpa [#allocation12], 1 }
0x18de   :  { %2661 = vsyncpa [#allocation15], 1 }
0x18df   :  { %2662 = vsyncpa [#allocation18], 1 }
0x18e0   :  { %2663 = vsyncpa [#allocation21], 1 }
0x18e1   :  { %2664 = vsyncpa [#allocation4], 1 }
0x18e2   :  { %2666 = vsyncpa [#allocation4 + $0x1], 1 }

</bundles_post_ra>
